<compile_context>
chip_gen: v7x
topology: tpu7x:2x2x1
jax: 0.10.0
libtpu: 0.0.40
codegen_flags: <defaults>
</compile_context>

<pallas_src>
import functools

import jax
import jax.numpy as jnp
from jax.experimental import pallas as pl
from jax.experimental.pallas import tpu as pltpu

Q_DIM = 128  # hidden width of BClassifier.q in DSMIL (hardcoded in the module)
_VMEM_LIMIT = 40 * 1024 * 1024


# --------------------------------------------------------------------------
# Pass 1: instance classifier (lane-dense) + running critical-instance state
#         + q_max (scaled) at finalize
# --------------------------------------------------------------------------
def _inst_kernel(x_ref, wi_ref, bi_ref, wq1_ref, bq1_ref, wq2_ref, bq2_ref,
                 cls_ref, qmax_ref,
                 runmax_ref, runmf_ref,
                 *, n_valid, tile_n, mask):
    t = pl.program_id(0)
    last_t = pl.num_programs(0) - 1

    x = x_ref[...]                                               # (T, K)

    # Instance classes computed directly lane-dense: (C, T).
    cls = jnp.einsum('ck,nk->cn', wi_ref[...], x,
                     preferred_element_type=jnp.float32) + bi_ref[...]
    cls_ref[...] = cls

    @pl.when(t == 0)
    def _init():
        runmax_ref[...] = jnp.full_like(runmax_ref, -jnp.inf)
        runmf_ref[...] = jnp.zeros_like(runmf_ref)

    # Tile-local per-class argmax (first index on ties), all in (C, T) layout.
    lane_idx = jax.lax.broadcasted_iota(jnp.int32, cls.shape, 1)  # (C, T)
    if mask:
        valid = lane_idx < (n_valid - t * tile_n)
        cls_m = jnp.where(valid, cls, -jnp.inf)                   # padded rows lose
    else:
        cls_m = cls

    tsize = cls.shape[1]
    tile_max = jnp.max(cls_m, axis=1, keepdims=True)              # (C, 1)
    first = jnp.min(jnp.where(cls_m == tile_max, lane_idx, tsize),
                    axis=1, keepdims=True)                        # (C, 1)
    onehot = (lane_idx == first).astype(jnp.float32)              # (C, T)
    tile_mf = jnp.dot(onehot, x, preferred_element_type=jnp.float32)  # (C, K)

    # Cross-tile merge: strictly greater => earliest tile wins ties
    # (matches jnp.argmax / torch.sort first-index convention).
    upd = tile_max > runmax_ref[...]                              # (C, 1) bool
    runmf_ref[...] = jnp.where(upd, tile_mf, runmf_ref[...])
    runmax_ref[...] = jnp.maximum(runmax_ref[...], tile_max)

    @pl.when(t == last_t)
    def _finalize():
        mf = runmf_ref[...]                                       # (C, K)
        h = jnp.maximum(
            jnp.dot(mf, wq1_ref[...], preferred_element_type=jnp.float32)
            + bq1_ref[...], 0.0)
        qm = jnp.tanh(jnp.dot(h, wq2_ref[...],
                              preferred_element_type=jnp.float32) + bq2_ref[...])
        # Fold the 1/sqrt(Q_DIM) attention scale into q_max.
        qmax_ref[...] = qm * (1.0 / jnp.sqrt(jnp.float32(Q_DIM)))


# --------------------------------------------------------------------------
# Pass 2: recompute Q per tile, unnormalized attention scores, softmax sum,
#         bag feature B and bag prediction (single sweep)
# --------------------------------------------------------------------------
def _bag_kernel(x_ref, wq1_ref, bq1_ref, wq2_ref, bq2_ref, qmax_ref,
                wfcc_ref, bfcc_ref,
                a_ref, b_ref, pred_ref, inv_ref,
                ssum_ref, bacc_ref,
                *, n_valid, tile_n, mask):
    t = pl.program_id(0)
    last_t = pl.num_programs(0) - 1

    x = x_ref[...]                                                # (T, K)

    # Recompute Q from the VMEM-resident x tile (no HBM Q intermediate).
    h = jnp.maximum(
        jnp.dot(x, wq1_ref[...], preferred_element_type=jnp.float32)
        + bq1_ref[...], 0.0)
    q = jnp.tanh(jnp.dot(h, wq2_ref[...],
                         preferred_element_type=jnp.float32) + bq2_ref[...])  # (T, Q)

    # Attention scores, lane-dense (C, T); scale already folded into q_max.
    # |logit| <= sqrt(Q_DIM) (tanh outputs), so exp() is f32-safe unnormalized.
    e = jnp.exp(jnp.einsum('cq,nq->cn', qmax_ref[...], q,
                           preferred_element_type=jnp.float32))   # (C, T)
    if mask:
        lane_idx = jax.lax.broadcasted_iota(jnp.int32, e.shape, 1)
        e = jnp.where(lane_idx < (n_valid - t * tile_n), e, 0.0)

    # Unnormalized scores out; wrapper normalizes during the transpose.
    a_ref[...] = e

    @pl.when(t == 0)
    def _init():
        ssum_ref[...] = jnp.zeros_like(ssum_ref)
        bacc_ref[...] = jnp.zeros_like(bacc_ref)

    ssum_ref[...] += jnp.sum(e, axis=-1, keepdims=True)           # (C, 1)
    bacc_ref[...] += jnp.dot(e, x, preferred_element_type=jnp.float32)  # (C, K)

    @pl.when(t == last_t)
    def _finalize():
        inv = 1.0 / ssum_ref[...]                                 # (C, 1), once/bag
        bfin = bacc_ref[...] * inv                                # (C, K)
        b_ref[...] = bfin
        inv_ref[...] = inv
        # fcc = Conv1d(C, C, kernel_size=K):
        #   pred[o] = sum_{d,k} W[o,d,k] * B[d,k] + bias[o]
        # wfcc_ref layout is (C_in, C_out, K): lane-dense, leading-dim indexed.
        pred = bfcc_ref[...]                                      # (C_out, 1)
        for d in range(wfcc_ref.shape[0]):
            pred = pred + jnp.sum(wfcc_ref[d] * bfin[d:d + 1, :],
                                  axis=-1, keepdims=True)
        pred_ref[...] = pred                                      # (C_out, 1)


# --------------------------------------------------------------------------
# Wrapper
# --------------------------------------------------------------------------
def _pick_tile(n, k, max_tile_n):
    """K-aware tile size; ragged N is handled by padding, never whole-bag."""
    # Rough per-row VMEM cost in pass 2: x row + Q/h intermediates (f32),
    # double-buffered x. Keep the streamed working set around ~12 MB.
    bytes_per_row = 4 * (k + 4 * Q_DIM)
    cap = min(max_tile_n, max(128, (12 * 1024 * 1024) // (2 * bytes_per_row)))
    cap = max(128, (cap // 128) * 128)
    if n <= cap:
        return ((n + 7) // 8) * 8          # single tile, sublane-aligned
    return cap


@functools.partial(jax.jit, static_argnames=("max_tile_n",))
def milnet_forward(x, params, max_tile_n=2048):
    n, k = x.shape
    c = params['bi_col'].shape[0]

    tile_n = _pick_tile(n, k, max_tile_n)
    n_pad = ((n + tile_n - 1) // tile_n) * tile_n
    num_tiles = n_pad // tile_n
    mask = n_pad != n
    x_in = jnp.pad(x, ((0, n_pad - n), (0, 0))) if mask else x

    inst_kernel = functools.partial(_inst_kernel, n_valid=n, tile_n=tile_n,
                                    mask=mask)
    bag_kernel = functools.partial(_bag_kernel, n_valid=n, tile_n=tile_n,
                                   mask=mask)

    # ---- pass 1: classes (lane-dense) + q_max ----
    classes_cn, qmax = pl.pallas_call(
        inst_kernel,
        out_shape=(
            jax.ShapeDtypeStruct((c, n_pad), jnp.float32),    # classes (C, N)
            jax.ShapeDtypeStruct((c, Q_DIM), jnp.float32),    # q_max (scaled)
        ),
        grid=(num_tiles,),
        in_specs=[
            pl.BlockSpec((tile_n, k), lambda t: (t, 0)),
            pl.BlockSpec((c, k), lambda t: (0, 0)),
            pl.BlockSpec((c, 1), lambda t: (0, 0)),
            pl.BlockSpec((k, Q_DIM), lambda t: (0, 0)),
            pl.BlockSpec((1, Q_DIM), lambda t: (0, 0)),
            pl.BlockSpec((Q_DIM, Q_DIM), lambda t: (0, 0)),
            pl.BlockSpec((1, Q_DIM), lambda t: (0, 0)),
        ],
        out_specs=(
            pl.BlockSpec((c, tile_n), lambda t: (0, t)),
            pl.BlockSpec((c, Q_DIM), lambda t: (0, 0)),
        ),
        scratch_shapes=[
            pltpu.VMEM((c, 1), jnp.float32),      # running per-class max
            pltpu.VMEM((c, k), jnp.float32),      # running critical-instance feats
        ],
        compiler_params=pltpu.CompilerParams(
            dimension_semantics=("arbitrary",),   # carries running argmax state
            vmem_limit_bytes=_VMEM_LIMIT),
    )(x_in, params['wi_ck'], params['bi_col'],
      params['wq1_t'], params['bq1'], params['wq2_t'], params['bq2'])

    # ---- pass 2: attention scores, softmax sum, B, prediction_bag ----
    a_cn, b_mat, pred_col, inv_col = pl.pallas_call(
        bag_kernel,
        out_shape=(
            jax.ShapeDtypeStruct((c, n_pad), jnp.float32),    # unnormalized scores
            jax.ShapeDtypeStruct((c, k), jnp.float32),        # B
            jax.ShapeDtypeStruct((c, 1), jnp.float32),        # prediction (column)
            jax.ShapeDtypeStruct((c, 1), jnp.float32),        # 1 / softmax sum
        ),
        grid=(num_tiles,),
        in_specs=[
            pl.BlockSpec((tile_n, k), lambda t: (t, 0)),
            pl.BlockSpec((k, Q_DIM), lambda t: (0, 0)),
            pl.BlockSpec((1, Q_DIM), lambda t: (0, 0)),
            pl.BlockSpec((Q_DIM, Q_DIM), lambda t: (0, 0)),
            pl.BlockSpec((1, Q_DIM), lambda t: (0, 0)),
            pl.BlockSpec((c, Q_DIM), lambda t: (0, 0)),
            pl.BlockSpec((c, c, k), lambda t: (0, 0, 0)),
            pl.BlockSpec((c, 1), lambda t: (0, 0)),
        ],
        out_specs=(
            pl.BlockSpec((c, tile_n), lambda t: (0, t)),
            pl.BlockSpec((c, k), lambda t: (0, 0)),
            pl.BlockSpec((c, 1), lambda t: (0, 0)),
            pl.BlockSpec((c, 1), lambda t: (0, 0)),
        ),
        scratch_shapes=[
            pltpu.VMEM((c, 1), jnp.float32),      # softmax denominator
            pltpu.VMEM((c, k), jnp.float32),      # unnormalized B accumulator
        ],
        compiler_params=pltpu.CompilerParams(
            dimension_semantics=("arbitrary",),
            vmem_limit_bytes=_VMEM_LIMIT),
    )(x_in, params['wq1_t'], params['bq1'], params['wq2_t'], params['bq2'],
      qmax, params['wfcc_dok'], params['bfcc_col'])

    # Module returns (classes, prediction_bag, A, B).
    classes = jnp.transpose(classes_cn[:, :n])                    # (N, C)
    A = jnp.transpose(a_cn[:, :n] * inv_col)                      # normalize + transpose
    prediction_bag = jnp.reshape(pred_col, (1, c))
    return classes, prediction_bag, A, b_mat


# --------------------------------------------------------------------------
# Parameters + pure-JAX reference (mirrors the PyTorch forward)
# --------------------------------------------------------------------------
def init_params(key, feature_size, num_classes):
    """Deterministic PyTorch-style (uniform +-1/sqrt(fan_in)) init."""
    ks = jax.random.split(key, 8)

    def lin(kw, kb, fan_in, fan_out):
        bound = 1.0 / jnp.sqrt(jnp.float32(fan_in))
        w = jax.random.uniform(kw, (fan_out, fan_in), jnp.float32, -bound, bound)
        b = jax.random.uniform(kb, (fan_out,), jnp.float32, -bound, bound)
        return w, b

    wi, bi = lin(ks[0], ks[1], feature_size, num_classes)          # (C, K), (C,)
    wq1, bq1 = lin(ks[2], ks[3], feature_size, Q_DIM)
    wq2, bq2 = lin(ks[4], ks[5], Q_DIM, Q_DIM)
    # Conv1d(C, C, kernel_size=K): weight (C_out, C_in, K), bias (C_out,)
    bound = 1.0 / jnp.sqrt(jnp.float32(num_classes * feature_size))
    wfcc = jax.random.uniform(ks[6], (num_classes, num_classes, feature_size),
                              jnp.float32, -bound, bound)
    bfcc = jax.random.uniform(ks[7], (num_classes,), jnp.float32, -bound, bound)

    return {
        'wi_ck': wi,                 # (C, K)  native Linear layout (lane-dense)
        'bi_col': bi[:, None],       # (C, 1)
        'wq1_t': wq1.T, 'bq1': bq1[None, :],
        'wq2_t': wq2.T, 'bq2': bq2[None, :],
        # conv weight re-laid out [c_out, c_in, k] -> [c_in, c_out, k]
        'wfcc_dok': jnp.transpose(wfcc, (1, 0, 2)),
        'bfcc_col': bfcc[:, None],   # (C, 1)
    }


def milnet_reference(x, p):
    """Pure-JAX reference mirroring the PyTorch forward."""
    feats = x
    classes = feats @ p['wi_ck'].T + p['bi_col'].T

    def q_net(f):
        h = jnp.maximum(f @ p['wq1_t'] + p['bq1'], 0.0)
        return jnp.tanh(h @ p['wq2_t'] + p['bq2'])

    Q = q_net(feats)
    idx = jnp.argmax(classes, axis=0)            # m_indices[0, :]
    m_feats = feats[idx]
    q_max = q_net(m_feats)
    A = Q @ q_max.T
    A = jax.nn.softmax(A / jnp.sqrt(jnp.float32(Q.shape[1])), axis=0)
    B = A.T @ feats
    pred = jnp.einsum('dok,dk->o', p['wfcc_dok'], B)[None, :] + p['bfcc_col'].T
    return classes, pred, A, B


if __name__ == "__main__":
    key = jax.random.PRNGKey(0)

    def check(n, k_feat, c, max_tile_n):
        k_x, k_p = jax.random.split(jax.random.fold_in(key, n))
        x = jax.random.normal(k_x, (n, k_feat), dtype=jnp.float32)
        params = init_params(k_p, k_feat, c)

        outs = jax.block_until_ready(milnet_forward(x, params,
                                                    max_tile_n=max_tile_n))
        ref = milnet_reference(x, params)
        names = ("classes", "prediction_bag", "A", "B")
        for name, got, want in zip(names, outs, ref):
            assert got.shape == want.shape, (name, got.shape, want.shape)
            err = float(jnp.max(jnp.abs(got - want)))
            assert jnp.allclose(got, want, rtol=2e-3, atol=2e-3), (name, err)

    # Multi-tile bag (4 instance tiles), N divisible by the tile.
    check(1024, 256, 4, 256)
    # Ragged bag: exercises the zero-pad + validity-mask path (last tile
    # only partially valid for the argmax / softmax / B accumulation).
    check(777, 256, 4, 256)

    print("KERNEL_OK")
</pallas_src>

<mosaic_0001>
module attributes {stable_mosaic.version = 11 : i64} {
  func.func @_inst_kernel(%arg0: i32, %arg1: memref<256x256xf32, #tpu.memory_space<vmem>>, %arg2: memref<4x256xf32, #tpu.memory_space<vmem>>, %arg3: memref<4x1xf32, #tpu.memory_space<vmem>>, %arg4: memref<256x128xf32, #tpu.memory_space<vmem>>, %arg5: memref<1x128xf32, #tpu.memory_space<vmem>>, %arg6: memref<128x128xf32, #tpu.memory_space<vmem>>, %arg7: memref<1x128xf32, #tpu.memory_space<vmem>>, %arg8: memref<4x256xf32, #tpu.memory_space<vmem>>, %arg9: memref<4x128xf32, #tpu.memory_space<vmem>>, %arg10: memref<4x1xf32, #tpu.memory_space<vmem>>, %arg11: memref<4x256xf32, #tpu.memory_space<vmem>>) attributes {dimension_semantics = [#tpu.dimension_semantics<arbitrary>], iteration_bounds = array<i64: 4>, scalar_prefetch = 0 : i64, scratch_operands = 2 : i64, tpu.core_type = #tpu.core_type<tc>, window_params = [{transform_indices = @transform_0, window_bounds = array<i64: 256, 256>}, {pipeline_mode = #tpu.pipeline_mode<synchronous>, transform_indices = @transform_1, window_bounds = array<i64: 4, 256>}, {pipeline_mode = #tpu.pipeline_mode<synchronous>, transform_indices = @transform_2, window_bounds = array<i64: 4, 1>}, {pipeline_mode = #tpu.pipeline_mode<synchronous>, transform_indices = @transform_3, window_bounds = array<i64: 256, 128>}, {pipeline_mode = #tpu.pipeline_mode<synchronous>, transform_indices = @transform_4, window_bounds = array<i64: 1, 128>}, {pipeline_mode = #tpu.pipeline_mode<synchronous>, transform_indices = @transform_5, window_bounds = array<i64: 128, 128>}, {pipeline_mode = #tpu.pipeline_mode<synchronous>, transform_indices = @transform_6, window_bounds = array<i64: 1, 128>}, {transform_indices = @transform_7, window_bounds = array<i64: 4, 256>}, {pipeline_mode = #tpu.pipeline_mode<synchronous>, transform_indices = @transform_8, window_bounds = array<i64: 4, 128>}]} {
    %c0 = arith.constant 0 : index
    %c0_0 = arith.constant 0 : index
    %0 = vector.load %arg1[%c0, %c0_0] : memref<256x256xf32, #tpu.memory_space<vmem>>, vector<256x256xf32>
    %c0_1 = arith.constant 0 : index
    %c0_2 = arith.constant 0 : index
    %1 = vector.load %arg2[%c0_1, %c0_2] : memref<4x256xf32, #tpu.memory_space<vmem>>, vector<4x256xf32>
    "tpu.trace_start"() <{level = 10 : i32, message = "ck,nk->cn"}> : () -> ()
    %cst = arith.constant dense<0.000000e+00> : vector<4x256xf32>
    %2 = tpu.matmul %1, %0, %cst {dimension_numbers = #tpu.dot_dimension_numbers<[1], [1], [0], [0], [0, 0, 1, 0], [], []>} : vector<4x256xf32>, vector<256x256xf32>, vector<4x256xf32> -> vector<4x256xf32>
    "tpu.trace_stop"() : () -> ()
    %c0_3 = arith.constant 0 : index
    %c0_4 = arith.constant 0 : index
    %3 = vector.load %arg3[%c0_3, %c0_4] : memref<4x1xf32, #tpu.memory_space<vmem>>, vector<4x1xf32>
    %4 = vector.broadcast %3 : vector<4x1xf32> to vector<4x256xf32>
    %5 = arith.addf %2, %4 : vector<4x256xf32>
    %c0_5 = arith.constant 0 : index
    %c0_6 = arith.constant 0 : index
    %6 = vector.load %arg8[%c0_5, %c0_6] : memref<4x256xf32, #tpu.memory_space<vmem>>, vector<4x256xf32>
    tpu.vector_store %arg8[%c0_5, %c0_6], %5 {strides = array<i32>} : memref<4x256xf32, #tpu.memory_space<vmem>>, vector<4x256xf32>,
    %c0_i32 = arith.constant 0 : i32
    %7 = arith.cmpi eq, %arg0, %c0_i32 : i32
    %8 = arith.extui %7 : i1 to i32
    %c0_i32_7 = arith.constant 0 : i32
    %9 = arith.cmpi ne, %8, %c0_i32_7 : i32
    scf.if %9 {
      %cst_22 = arith.constant 0xFF800000 : f32
      %37 = vector.broadcast %cst_22 : f32 to vector<4x1xf32>
      %c0_23 = arith.constant 0 : index
      %c0_24 = arith.constant 0 : index
      %38 = vector.load %arg10[%c0_23, %c0_24] : memref<4x1xf32, #tpu.memory_space<vmem>>, vector<4x1xf32>
      tpu.vector_store %arg10[%c0_23, %c0_24], %37 {strides = array<i32>} : memref<4x1xf32, #tpu.memory_space<vmem>>, vector<4x1xf32>,
      %cst_25 = arith.constant 0.000000e+00 : f32
      %39 = vector.broadcast %cst_25 : f32 to vector<4x256xf32>
      %c0_26 = arith.constant 0 : index
      %c0_27 = arith.constant 0 : index
      %40 = vector.load %arg11[%c0_26, %c0_27] : memref<4x256xf32, #tpu.memory_space<vmem>>, vector<4x256xf32>
      tpu.vector_store %arg11[%c0_26, %c0_27], %39 {strides = array<i32>} : memref<4x256xf32, #tpu.memory_space<vmem>>, vector<4x256xf32>,
    } else {
    }
    %10 = tpu.iota {dimensions = array<i32: 1>} : vector<4x256xi32>
    %cst_8 = arith.constant dense<0xFF800000> : vector<4xf32>
    %11 = vector.multi_reduction <maximumf>, %5, %cst_8 [1] : vector<4x256xf32> to vector<4xf32>
    %12 = vector.shape_cast %11 : vector<4xf32> to vector<4x1xf32>
    %13 = vector.broadcast %12 : vector<4x1xf32> to vector<4x256xf32>
    %14 = arith.cmpf oeq, %5, %13 : vector<4x256xf32>
    %c256_i32 = arith.constant 256 : i32
    %15 = vector.broadcast %c256_i32 : i32 to vector<4x256xi32>
    %16 = arith.select %14, %10, %15 : vector<4x256xi1>, vector<4x256xi32>
    %cst_9 = arith.constant dense<2147483647> : vector<4xi32>
    %17 = vector.multi_reduction <minsi>, %16, %cst_9 [1] : vector<4x256xi32> to vector<4xi32>
    %18 = vector.shape_cast %17 : vector<4xi32> to vector<4x1xi32>
    %19 = vector.broadcast %18 : vector<4x1xi32> to vector<4x256xi32>
    %20 = arith.cmpi eq, %10, %19 : vector<4x256xi32>
    %21 = arith.extui %20 : vector<4x256xi1> to vector<4x256xi32>
    %22 = arith.sitofp %21 : vector<4x256xi32> to vector<4x256xf32>
    %cst_10 = arith.constant dense<0.000000e+00> : vector<4x256xf32>
    %23 = tpu.matmul %22, %0, %cst_10 {dimension_numbers = #tpu.dot_dimension_numbers<[1], [0], [0], [1], [0, 0, 1, 1], [], []>} : vector<4x256xf32>, vector<256x256xf32>, vector<4x256xf32> -> vector<4x256xf32>
    %c0_11 = arith.constant 0 : index
    %c0_12 = arith.constant 0 : index
    %24 = vector.load %arg10[%c0_11, %c0_12] : memref<4x1xf32, #tpu.memory_space<vmem>>, vector<4x1xf32>
    %25 = arith.cmpf ogt, %12, %24 : vector<4x1xf32>
    %c0_13 = arith.constant 0 : index
    %c0_14 = arith.constant 0 : index
    %26 = vector.load %arg11[%c0_13, %c0_14] : memref<4x256xf32, #tpu.memory_space<vmem>>, vector<4x256xf32>
    %27 = vector.shape_cast %25 : vector<4x1xi1> to vector<4x1xi1>
    %28 = vector.broadcast %27 : vector<4x1xi1> to vector<4x256xi1>
    %29 = arith.select %28, %23, %26 : vector<4x256xi1>, vector<4x256xf32>
    %c0_15 = arith.constant 0 : index
    %c0_16 = arith.constant 0 : index
    %30 = vector.load %arg11[%c0_15, %c0_16] : memref<4x256xf32, #tpu.memory_space<vmem>>, vector<4x256xf32>
    tpu.vector_store %arg11[%c0_15, %c0_16], %29 {strides = array<i32>} : memref<4x256xf32, #tpu.memory_space<vmem>>, vector<4x256xf32>,
    %c0_17 = arith.constant 0 : index
    %c0_18 = arith.constant 0 : index
    %31 = vector.load %arg10[%c0_17, %c0_18] : memref<4x1xf32, #tpu.memory_space<vmem>>, vector<4x1xf32>
    %32 = arith.maximumf %31, %12 : vector<4x1xf32>
    %c0_19 = arith.constant 0 : index
    %c0_20 = arith.constant 0 : index
    %33 = vector.load %arg10[%c0_19, %c0_20] : memref<4x1xf32, #tpu.memory_space<vmem>>, vector<4x1xf32>
    tpu.vector_store %arg10[%c0_19, %c0_20], %32 {strides = array<i32>} : memref<4x1xf32, #tpu.memory_space<vmem>>, vector<4x1xf32>,
    %c3_i32 = arith.constant 3 : i32
    %34 = arith.cmpi eq, %arg0, %c3_i32 : i32
    %35 = arith.extui %34 : i1 to i32
    %c0_i32_21 = arith.constant 0 : i32
    %36 = arith.cmpi ne, %35, %c0_i32_21 : i32
    scf.if %36 {
      %c0_22 = arith.constant 0 : index
      %c0_23 = arith.constant 0 : index
      %37 = vector.load %arg11[%c0_22, %c0_23] : memref<4x256xf32, #tpu.memory_space<vmem>>, vector<4x256xf32>
      %c0_24 = arith.constant 0 : index
      %c0_25 = arith.constant 0 : index
      %38 = vector.load %arg4[%c0_24, %c0_25] : memref<256x128xf32, #tpu.memory_space<vmem>>, vector<256x128xf32>
      %cst_26 = arith.constant dense<0.000000e+00> : vector<4x128xf32>
      %39 = tpu.matmul %37, %38, %cst_26 {dimension_numbers = #tpu.dot_dimension_numbers<[1], [0], [0], [1], [0, 0, 1, 1], [], []>} : vector<4x256xf32>, vector<256x128xf32>, vector<4x128xf32> -> vector<4x128xf32>
      %c0_27 = arith.constant 0 : index
      %c0_28 = arith.constant 0 : index
      %40 = vector.load %arg5[%c0_27, %c0_28] : memref<1x128xf32, #tpu.memory_space<vmem>>, vector<1x128xf32>
      %41 = vector.broadcast %40 : vector<1x128xf32> to vector<4x128xf32>
      %42 = arith.addf %39, %41 : vector<4x128xf32>
      %cst_29 = arith.constant 0.000000e+00 : f32
      %43 = vector.broadcast %cst_29 : f32 to vector<4x128xf32>
      %44 = arith.maximumf %42, %43 : vector<4x128xf32>
      %c0_30 = arith.constant 0 : index
      %c0_31 = arith.constant 0 : index
      %45 = vector.load %arg6[%c0_30, %c0_31] : memref<128x128xf32, #tpu.memory_space<vmem>>, vector<128x128xf32>
      %cst_32 = arith.constant dense<0.000000e+00> : vector<4x128xf32>
      %46 = tpu.matmul %44, %45, %cst_32 {dimension_numbers = #tpu.dot_dimension_numbers<[1], [0], [0], [1], [0, 0, 1, 1], [], []>} : vector<4x128xf32>, vector<128x128xf32>, vector<4x128xf32> -> vector<4x128xf32>
      %c0_33 = arith.constant 0 : index
      %c0_34 = arith.constant 0 : index
      %47 = vector.load %arg7[%c0_33, %c0_34] : memref<1x128xf32, #tpu.memory_space<vmem>>, vector<1x128xf32>
      %48 = vector.broadcast %47 : vector<1x128xf32> to vector<4x128xf32>
      %49 = arith.addf %46, %48 : vector<4x128xf32>
      %50 = math.tanh %49 : vector<4x128xf32>
      %cst_35 = arith.constant 1.280000e+02 : f32
      %51 = math.sqrt %cst_35 : f32
      %cst_36 = arith.constant 1.000000e+00 : f32
      %52 = arith.divf %cst_36, %51 : f32
      %53 = vector.broadcast %52 : f32 to vector<4x128xf32>
      %54 = arith.mulf %50, %53 : vector<4x128xf32>
      %c0_37 = arith.constant 0 : index
      %c0_38 = arith.constant 0 : index
      %55 = vector.load %arg9[%c0_37, %c0_38] : memref<4x128xf32, #tpu.memory_space<vmem>>, vector<4x128xf32>
      tpu.vector_store %arg9[%c0_37, %c0_38], %54 {strides = array<i32>} : memref<4x128xf32, #tpu.memory_space<vmem>>, vector<4x128xf32>,
    } else {
    }
    return
  }
  func.func @transform_0(%arg0: i32) -> (i32, i32) {
    %c0_i32 = arith.constant 0 : i32
    %c0_i32_0 = arith.constant 0 : i32
    return %arg0, %c0_i32 : i32, i32
  }
  func.func @transform_1(%arg0: i32) -> (i32, i32) {
    %c0_i32 = arith.constant 0 : i32
    %c0_i32_0 = arith.constant 0 : i32
    %c0_i32_1 = arith.constant 0 : i32
    return %c0_i32, %c0_i32_0 : i32, i32
  }
  func.func @transform_2(%arg0: i32) -> (i32, i32) {
    %c0_i32 = arith.constant 0 : i32
    %c0_i32_0 = arith.constant 0 : i32
    %c0_i32_1 = arith.constant 0 : i32
    return %c0_i32, %c0_i32_0 : i32, i32
  }
  func.func @transform_3(%arg0: i32) -> (i32, i32) {
    %c0_i32 = arith.constant 0 : i32
    %c0_i32_0 = arith.constant 0 : i32
    %c0_i32_1 = arith.constant 0 : i32
    return %c0_i32, %c0_i32_0 : i32, i32
  }
  func.func @transform_4(%arg0: i32) -> (i32, i32) {
    %c0_i32 = arith.constant 0 : i32
    %c0_i32_0 = arith.constant 0 : i32
    %c0_i32_1 = arith.constant 0 : i32
    return %c0_i32, %c0_i32_0 : i32, i32
  }
  func.func @transform_5(%arg0: i32) -> (i32, i32) {
    %c0_i32 = arith.constant 0 : i32
    %c0_i32_0 = arith.constant 0 : i32
    %c0_i32_1 = arith.constant 0 : i32
    return %c0_i32, %c0_i32_0 : i32, i32
  }
  func.func @transform_6(%arg0: i32) -> (i32, i32) {
    %c0_i32 = arith.constant 0 : i32
    %c0_i32_0 = arith.constant 0 : i32
    %c0_i32_1 = arith.constant 0 : i32
    return %c0_i32, %c0_i32_0 : i32, i32
  }
  func.func @transform_7(%arg0: i32) -> (i32, i32) {
    %c0_i32 = arith.constant 0 : i32
    %c0_i32_0 = arith.constant 0 : i32
    return %c0_i32, %arg0 : i32, i32
  }
  func.func @transform_8(%arg0: i32) -> (i32, i32) {
    %c0_i32 = arith.constant 0 : i32
    %c0_i32_0 = arith.constant 0 : i32
    %c0_i32_1 = arith.constant 0 : i32
    return %c0_i32, %c0_i32_0 : i32, i32
  }
}

module attributes {stable_mosaic.version = 11 : i64} {
  func.func @_bag_kernel(%arg0: i32, %arg1: memref<256x256xf32, #tpu.memory_space<vmem>>, %arg2: memref<256x128xf32, #tpu.memory_space<vmem>>, %arg3: memref<1x128xf32, #tpu.memory_space<vmem>>, %arg4: memref<128x128xf32, #tpu.memory_space<vmem>>, %arg5: memref<1x128xf32, #tpu.memory_space<vmem>>, %arg6: memref<4x128xf32, #tpu.memory_space<vmem>>, %arg7: memref<4x4x256xf32, #tpu.memory_space<vmem>>, %arg8: memref<4x1xf32, #tpu.memory_space<vmem>>, %arg9: memref<4x256xf32, #tpu.memory_space<vmem>>, %arg10: memref<4x256xf32, #tpu.memory_space<vmem>>, %arg11: memref<4x1xf32, #tpu.memory_space<vmem>>, %arg12: memref<4x1xf32, #tpu.memory_space<vmem>>, %arg13: memref<4x1xf32, #tpu.memory_space<vmem>>, %arg14: memref<4x256xf32, #tpu.memory_space<vmem>>) attributes {dimension_semantics = [#tpu.dimension_semantics<arbitrary>], iteration_bounds = array<i64: 4>, scalar_prefetch = 0 : i64, scratch_operands = 2 : i64, tpu.core_type = #tpu.core_type<tc>, window_params = [{transform_indices = @transform_0, window_bounds = array<i64: 256, 256>}, {pipeline_mode = #tpu.pipeline_mode<synchronous>, transform_indices = @transform_1, window_bounds = array<i64: 256, 128>}, {pipeline_mode = #tpu.pipeline_mode<synchronous>, transform_indices = @transform_2, window_bounds = array<i64: 1, 128>}, {pipeline_mode = #tpu.pipeline_mode<synchronous>, transform_indices = @transform_3, window_bounds = array<i64: 128, 128>}, {pipeline_mode = #tpu.pipeline_mode<synchronous>, transform_indices = @transform_4, window_bounds = array<i64: 1, 128>}, {pipeline_mode = #tpu.pipeline_mode<synchronous>, transform_indices = @transform_5, window_bounds = array<i64: 4, 128>}, {pipeline_mode = #tpu.pipeline_mode<synchronous>, transform_indices = @transform_6, window_bounds = array<i64: 4, 4, 256>}, {pipeline_mode = #tpu.pipeline_mode<synchronous>, transform_indices = @transform_7, window_bounds = array<i64: 4, 1>}, {transform_indices = @transform_8, window_bounds = array<i64: 4, 256>}, {pipeline_mode = #tpu.pipeline_mode<synchronous>, transform_indices = @transform_9, window_bounds = array<i64: 4, 256>}, {pipeline_mode = #tpu.pipeline_mode<synchronous>, transform_indices = @transform_10, window_bounds = array<i64: 4, 1>}, {pipeline_mode = #tpu.pipeline_mode<synchronous>, transform_indices = @transform_11, window_bounds = array<i64: 4, 1>}]} {
    %c0 = arith.constant 0 : index
    %c0_0 = arith.constant 0 : index
    %0 = vector.load %arg1[%c0, %c0_0] : memref<256x256xf32, #tpu.memory_space<vmem>>, vector<256x256xf32>
    %c0_1 = arith.constant 0 : index
    %c0_2 = arith.constant 0 : index
    %1 = vector.load %arg2[%c0_1, %c0_2] : memref<256x128xf32, #tpu.memory_space<vmem>>, vector<256x128xf32>
    %cst = arith.constant dense<0.000000e+00> : vector<256x128xf32>
    %2 = tpu.matmul %0, %1, %cst {dimension_numbers = #tpu.dot_dimension_numbers<[1], [0], [0], [1], [0, 0, 1, 1], [], []>} : vector<256x256xf32>, vector<256x128xf32>, vector<256x128xf32> -> vector<256x128xf32>
    %c0_3 = arith.constant 0 : index
    %c0_4 = arith.constant 0 : index
    %3 = vector.load %arg3[%c0_3, %c0_4] : memref<1x128xf32, #tpu.memory_space<vmem>>, vector<1x128xf32>
    %4 = vector.broadcast %3 : vector<1x128xf32> to vector<256x128xf32>
    %5 = arith.addf %2, %4 : vector<256x128xf32>
    %cst_5 = arith.constant 0.000000e+00 : f32
    %6 = vector.broadcast %cst_5 : f32 to vector<256x128xf32>
    %7 = arith.maximumf %5, %6 : vector<256x128xf32>
    %c0_6 = arith.constant 0 : index
    %c0_7 = arith.constant 0 : index
    %8 = vector.load %arg4[%c0_6, %c0_7] : memref<128x128xf32, #tpu.memory_space<vmem>>, vector<128x128xf32>
    %cst_8 = arith.constant dense<0.000000e+00> : vector<256x128xf32>
    %9 = tpu.matmul %7, %8, %cst_8 {dimension_numbers = #tpu.dot_dimension_numbers<[1], [0], [0], [1], [0, 0, 1, 1], [], []>} : vector<256x128xf32>, vector<128x128xf32>, vector<256x128xf32> -> vector<256x128xf32>
    %c0_9 = arith.constant 0 : index
    %c0_10 = arith.constant 0 : index
    %10 = vector.load %arg5[%c0_9, %c0_10] : memref<1x128xf32, #tpu.memory_space<vmem>>, vector<1x128xf32>
    %11 = vector.broadcast %10 : vector<1x128xf32> to vector<256x128xf32>
    %12 = arith.addf %9, %11 : vector<256x128xf32>
    %13 = math.tanh %12 : vector<256x128xf32>
    %c0_11 = arith.constant 0 : index
    %c0_12 = arith.constant 0 : index
    %14 = vector.load %arg6[%c0_11, %c0_12] : memref<4x128xf32, #tpu.memory_space<vmem>>, vector<4x128xf32>
    "tpu.trace_start"() <{level = 10 : i32, message = "cq,nq->cn"}> : () -> ()
    %cst_13 = arith.constant dense<0.000000e+00> : vector<4x256xf32>
    %15 = tpu.matmul %14, %13, %cst_13 {dimension_numbers = #tpu.dot_dimension_numbers<[1], [1], [0], [0], [0, 0, 1, 0], [], []>} : vector<4x128xf32>, vector<256x128xf32>, vector<4x256xf32> -> vector<4x256xf32>
    "tpu.trace_stop"() : () -> ()
    %16 = math.exp %15 : vector<4x256xf32>
    %c0_14 = arith.constant 0 : index
    %c0_15 = arith.constant 0 : index
    %17 = vector.load %arg9[%c0_14, %c0_15] : memref<4x256xf32, #tpu.memory_space<vmem>>, vector<4x256xf32>
    tpu.vector_store %arg9[%c0_14, %c0_15], %16 {strides = array<i32>} : memref<4x256xf32, #tpu.memory_space<vmem>>, vector<4x256xf32>,
    %c0_i32 = arith.constant 0 : i32
    %18 = arith.cmpi eq, %arg0, %c0_i32 : i32
    %19 = arith.extui %18 : i1 to i32
    %c0_i32_16 = arith.constant 0 : i32
    %20 = arith.cmpi ne, %19, %c0_i32_16 : i32
    scf.if %20 {
      %cst_28 = arith.constant 0.000000e+00 : f32
      %33 = vector.broadcast %cst_28 : f32 to vector<4x1xf32>
      %c0_29 = arith.constant 0 : index
      %c0_30 = arith.constant 0 : index
      %34 = vector.load %arg13[%c0_29, %c0_30] : memref<4x1xf32, #tpu.memory_space<vmem>>, vector<4x1xf32>
      tpu.vector_store %arg13[%c0_29, %c0_30], %33 {strides = array<i32>} : memref<4x1xf32, #tpu.memory_space<vmem>>, vector<4x1xf32>,
      %cst_31 = arith.constant 0.000000e+00 : f32
      %35 = vector.broadcast %cst_31 : f32 to vector<4x256xf32>
      %c0_32 = arith.constant 0 : index
      %c0_33 = arith.constant 0 : index
      %36 = vector.load %arg14[%c0_32, %c0_33] : memref<4x256xf32, #tpu.memory_space<vmem>>, vector<4x256xf32>
      tpu.vector_store %arg14[%c0_32, %c0_33], %35 {strides = array<i32>} : memref<4x256xf32, #tpu.memory_space<vmem>>, vector<4x256xf32>,
    } else {
    }
    %c0_17 = arith.constant 0 : index
    %c0_18 = arith.constant 0 : index
    %21 = vector.load %arg13[%c0_17, %c0_18] : memref<4x1xf32, #tpu.memory_space<vmem>>, vector<4x1xf32>
    %cst_19 = arith.constant dense<0.000000e+00> : vector<4xf32>
    %22 = vector.multi_reduction <add>, %16, %cst_19 [1] : vector<4x256xf32> to vector<4xf32>
    %23 = vector.shape_cast %22 : vector<4xf32> to vector<4x1xf32>
    %24 = arith.addf %21, %23 : vector<4x1xf32>
    %c0_20 = arith.constant 0 : index
    %c0_21 = arith.constant 0 : index
    %25 = vector.load %arg13[%c0_20, %c0_21] : memref<4x1xf32, #tpu.memory_space<vmem>>, vector<4x1xf32>
    tpu.vector_store %arg13[%c0_20, %c0_21], %24 {strides = array<i32>} : memref<4x1xf32, #tpu.memory_space<vmem>>, vector<4x1xf32>,
    %c0_22 = arith.constant 0 : index
    %c0_23 = arith.constant 0 : index
    %26 = vector.load %arg14[%c0_22, %c0_23] : memref<4x256xf32, #tpu.memory_space<vmem>>, vector<4x256xf32>
    %cst_24 = arith.constant dense<0.000000e+00> : vector<4x256xf32>
    %27 = tpu.matmul %16, %0, %cst_24 {dimension_numbers = #tpu.dot_dimension_numbers<[1], [0], [0], [1], [0, 0, 1, 1], [], []>} : vector<4x256xf32>, vector<256x256xf32>, vector<4x256xf32> -> vector<4x256xf32>
    %28 = arith.addf %26, %27 : vector<4x256xf32>
    %c0_25 = arith.constant 0 : index
    %c0_26 = arith.constant 0 : index
    %29 = vector.load %arg14[%c0_25, %c0_26] : memref<4x256xf32, #tpu.memory_space<vmem>>, vector<4x256xf32>
    tpu.vector_store %arg14[%c0_25, %c0_26], %28 {strides = array<i32>} : memref<4x256xf32, #tpu.memory_space<vmem>>, vector<4x256xf32>,
    %c3_i32 = arith.constant 3 : i32
    %30 = arith.cmpi eq, %arg0, %c3_i32 : i32
    %31 = arith.extui %30 : i1 to i32
    %c0_i32_27 = arith.constant 0 : i32
    %32 = arith.cmpi ne, %31, %c0_i32_27 : i32
    scf.if %32 {
      %c0_28 = arith.constant 0 : index
      %c0_29 = arith.constant 0 : index
      %33 = vector.load %arg13[%c0_28, %c0_29] : memref<4x1xf32, #tpu.memory_space<vmem>>, vector<4x1xf32>
      %cst_30 = arith.constant 1.000000e+00 : f32
      %34 = vector.broadcast %cst_30 : f32 to vector<4x1xf32>
      %35 = arith.divf %34, %33 : vector<4x1xf32>
      %c0_31 = arith.constant 0 : index
      %c0_32 = arith.constant 0 : index
      %36 = vector.load %arg14[%c0_31, %c0_32] : memref<4x256xf32, #tpu.memory_space<vmem>>, vector<4x256xf32>
      %37 = vector.broadcast %35 : vector<4x1xf32> to vector<4x256xf32>
      %38 = arith.mulf %36, %37 : vector<4x256xf32>
      %c0_33 = arith.constant 0 : index
      %c0_34 = arith.constant 0 : index
      %39 = vector.load %arg10[%c0_33, %c0_34] : memref<4x256xf32, #tpu.memory_space<vmem>>, vector<4x256xf32>
      tpu.vector_store %arg10[%c0_33, %c0_34], %38 {strides = array<i32>} : memref<4x256xf32, #tpu.memory_space<vmem>>, vector<4x256xf32>,
      %c0_35 = arith.constant 0 : index
      %c0_36 = arith.constant 0 : index
      %40 = vector.load %arg12[%c0_35, %c0_36] : memref<4x1xf32, #tpu.memory_space<vmem>>, vector<4x1xf32>
      tpu.vector_store %arg12[%c0_35, %c0_36], %35 {strides = array<i32>} : memref<4x1xf32, #tpu.memory_space<vmem>>, vector<4x1xf32>,
      %c0_37 = arith.constant 0 : index
      %c0_38 = arith.constant 0 : index
      %41 = vector.load %arg8[%c0_37, %c0_38] : memref<4x1xf32, #tpu.memory_space<vmem>>, vector<4x1xf32>
      %c0_39 = arith.constant 0 : index
      %c0_40 = arith.constant 0 : index
      %c0_41 = arith.constant 0 : index
      %42 = vector.load %arg7[%c0_39, %c0_40, %c0_41] : memref<4x4x256xf32, #tpu.memory_space<vmem>>, vector<1x4x256xf32>
      %43 = vector.shape_cast %42 : vector<1x4x256xf32> to vector<4x256xf32>
      %44 = vector.extract_strided_slice %38 {offsets = [0, 0], sizes = [1, 256], strides = [1, 1]} : vector<4x256xf32> to vector<1x256xf32>
      %45 = vector.broadcast %44 : vector<1x256xf32> to vector<4x256xf32>
      %46 = arith.mulf %43, %45 : vector<4x256xf32>
      %cst_42 = arith.constant dense<0.000000e+00> : vector<4xf32>
      %47 = vector.multi_reduction <add>, %46, %cst_42 [1] : vector<4x256xf32> to vector<4xf32>
      %48 = vector.shape_cast %47 : vector<4xf32> to vector<4x1xf32>
      %49 = arith.addf %41, %48 : vector<4x1xf32>
      %c1 = arith.constant 1 : index
      %c0_43 = arith.constant 0 : index
      %c0_44 = arith.constant 0 : index
      %50 = vector.load %arg7[%c1, %c0_43, %c0_44] : memref<4x4x256xf32, #tpu.memory_space<vmem>>, vector<1x4x256xf32>
      %51 = vector.shape_cast %50 : vector<1x4x256xf32> to vector<4x256xf32>
      %52 = vector.extract_strided_slice %38 {offsets = [1, 0], sizes = [1, 256], strides = [1, 1]} : vector<4x256xf32> to vector<1x256xf32>
      %53 = vector.broadcast %52 : vector<1x256xf32> to vector<4x256xf32>
      %54 = arith.mulf %51, %53 : vector<4x256xf32>
      %cst_45 = arith.constant dense<0.000000e+00> : vector<4xf32>
      %55 = vector.multi_reduction <add>, %54, %cst_45 [1] : vector<4x256xf32> to vector<4xf32>
      %56 = vector.shape_cast %55 : vector<4xf32> to vector<4x1xf32>
      %57 = arith.addf %49, %56 : vector<4x1xf32>
      %c2 = arith.constant 2 : index
      %c0_46 = arith.constant 0 : index
      %c0_47 = arith.constant 0 : index
      %58 = vector.load %arg7[%c2, %c0_46, %c0_47] : memref<4x4x256xf32, #tpu.memory_space<vmem>>, vector<1x4x256xf32>
      %59 = vector.shape_cast %58 : vector<1x4x256xf32> to vector<4x256xf32>
      %60 = vector.extract_strided_slice %38 {offsets = [2, 0], sizes = [1, 256], strides = [1, 1]} : vector<4x256xf32> to vector<1x256xf32>
      %61 = vector.broadcast %60 : vector<1x256xf32> to vector<4x256xf32>
      %62 = arith.mulf %59, %61 : vector<4x256xf32>
      %cst_48 = arith.constant dense<0.000000e+00> : vector<4xf32>
      %63 = vector.multi_reduction <add>, %62, %cst_48 [1] : vector<4x256xf32> to vector<4xf32>
      %64 = vector.shape_cast %63 : vector<4xf32> to vector<4x1xf32>
      %65 = arith.addf %57, %64 : vector<4x1xf32>
      %c3 = arith.constant 3 : index
      %c0_49 = arith.constant 0 : index
      %c0_50 = arith.constant 0 : index
      %66 = vector.load %arg7[%c3, %c0_49, %c0_50] : memref<4x4x256xf32, #tpu.memory_space<vmem>>, vector<1x4x256xf32>
      %67 = vector.shape_cast %66 : vector<1x4x256xf32> to vector<4x256xf32>
      %68 = vector.extract_strided_slice %38 {offsets = [3, 0], sizes = [1, 256], strides = [1, 1]} : vector<4x256xf32> to vector<1x256xf32>
      %69 = vector.broadcast %68 : vector<1x256xf32> to vector<4x256xf32>
      %70 = arith.mulf %67, %69 : vector<4x256xf32>
      %cst_51 = arith.constant dense<0.000000e+00> : vector<4xf32>
      %71 = vector.multi_reduction <add>, %70, %cst_51 [1] : vector<4x256xf32> to vector<4xf32>
      %72 = vector.shape_cast %71 : vector<4xf32> to vector<4x1xf32>
      %73 = arith.addf %65, %72 : vector<4x1xf32>
      %c0_52 = arith.constant 0 : index
      %c0_53 = arith.constant 0 : index
      %74 = vector.load %arg11[%c0_52, %c0_53] : memref<4x1xf32, #tpu.memory_space<vmem>>, vector<4x1xf32>
      tpu.vector_store %arg11[%c0_52, %c0_53], %73 {strides = array<i32>} : memref<4x1xf32, #tpu.memory_space<vmem>>, vector<4x1xf32>,
    } else {
    }
    return
  }
  func.func @transform_0(%arg0: i32) -> (i32, i32) {
    %c0_i32 = arith.constant 0 : i32
    %c0_i32_0 = arith.constant 0 : i32
    return %arg0, %c0_i32 : i32, i32
  }
  func.func @transform_1(%arg0: i32) -> (i32, i32) {
    %c0_i32 = arith.constant 0 : i32
    %c0_i32_0 = arith.constant 0 : i32
    %c0_i32_1 = arith.constant 0 : i32
    return %c0_i32, %c0_i32_0 : i32, i32
  }
  func.func @transform_2(%arg0: i32) -> (i32, i32) {
    %c0_i32 = arith.constant 0 : i32
    %c0_i32_0 = arith.constant 0 : i32
    %c0_i32_1 = arith.constant 0 : i32
    return %c0_i32, %c0_i32_0 : i32, i32
  }
  func.func @transform_3(%arg0: i32) -> (i32, i32) {
    %c0_i32 = arith.constant 0 : i32
    %c0_i32_0 = arith.constant 0 : i32
    %c0_i32_1 = arith.constant 0 : i32
    return %c0_i32, %c0_i32_0 : i32, i32
  }
  func.func @transform_4(%arg0: i32) -> (i32, i32) {
    %c0_i32 = arith.constant 0 : i32
    %c0_i32_0 = arith.constant 0 : i32
    %c0_i32_1 = arith.constant 0 : i32
    return %c0_i32, %c0_i32_0 : i32, i32
  }
  func.func @transform_5(%arg0: i32) -> (i32, i32) {
    %c0_i32 = arith.constant 0 : i32
    %c0_i32_0 = arith.constant 0 : i32
    %c0_i32_1 = arith.constant 0 : i32
    return %c0_i32, %c0_i32_0 : i32, i32
  }
  func.func @transform_6(%arg0: i32) -> (i32, i32, i32) {
    %c0_i32 = arith.constant 0 : i32
    %c0_i32_0 = arith.constant 0 : i32
    %c0_i32_1 = arith.constant 0 : i32
    %c0_i32_2 = arith.constant 0 : i32
    return %c0_i32, %c0_i32_0, %c0_i32_1 : i32, i32, i32
  }
  func.func @transform_7(%arg0: i32) -> (i32, i32) {
    %c0_i32 = arith.constant 0 : i32
    %c0_i32_0 = arith.constant 0 : i32
    %c0_i32_1 = arith.constant 0 : i32
    return %c0_i32, %c0_i32_0 : i32, i32
  }
  func.func @transform_8(%arg0: i32) -> (i32, i32) {
    %c0_i32 = arith.constant 0 : i32
    %c0_i32_0 = arith.constant 0 : i32
    return %c0_i32, %arg0 : i32, i32
  }
  func.func @transform_9(%arg0: i32) -> (i32, i32) {
    %c0_i32 = arith.constant 0 : i32
    %c0_i32_0 = arith.constant 0 : i32
    %c0_i32_1 = arith.constant 0 : i32
    return %c0_i32, %c0_i32_0 : i32, i32
  }
  func.func @transform_10(%arg0: i32) -> (i32, i32) {
    %c0_i32 = arith.constant 0 : i32
    %c0_i32_0 = arith.constant 0 : i32
    %c0_i32_1 = arith.constant 0 : i32
    return %c0_i32, %c0_i32_0 : i32, i32
  }
  func.func @transform_11(%arg0: i32) -> (i32, i32) {
    %c0_i32 = arith.constant 0 : i32
    %c0_i32_0 = arith.constant 0 : i32
    %c0_i32_1 = arith.constant 0 : i32
    return %c0_i32, %c0_i32_0 : i32, i32
  }
}

</mosaic_0001>

<bundles_post_ra>
// kernel: milnet_forward.2
= control target key start
LH: loop header
LB: loop body
LE: loop exit
PB: predicated region body
PF: predicated region fallthrough
CT: control target
= control target key end

     0   :  { %s2109_s0 = inlined_call_operand.hbm [shape: f32[1024,256], index: 0, kind: input, shape index: {}]   ;;  %s2110_s1 = inlined_call_operand.hbm [shape: f32[4,256], index: 1, kind: input, shape index: {}]   ;;  %s2111_s2 = inlined_call_operand.vmem [shape: f32[4,1], index: 2, kind: input, shape index: {}]   ;;  %s2112_s3 = inlined_call_operand.hbm [shape: f32[256,128], index: 3, kind: input, shape index: {}]   ;;  %s2113_s4 = inlined_call_operand.vmem [shape: f32[1,128], index: 4, kind: input, shape index: {}]   ;;  %s2114_s5 = inlined_call_operand.hbm [shape: f32[128,128], index: 5, kind: input, shape index: {}]   ;;  %s2115_s6 = inlined_call_operand.vmem [shape: f32[1,128], index: 6, kind: input, shape index: {}]   ;;  %s2116_s7 = inlined_call_operand.hbm [shape: f32[4,1024], index: 7, kind: output, shape index: {0}]   ;;  %s2117_s8 = inlined_call_operand.vmem [shape: f32[4,128], index: 8, kind: output, shape index: {1}]  }
   0x1   :  { %2121 = sst [smem:[#allocation17_spill]] %s2110_s1 }
   0x2   :  { %14 = vsyncpa [#allocation5], 0 }
   0x3   :  { %16 = vsyncpa [#allocation5 + $0x1], 0 }
   0x4   :  { %17 = vsyncpa [#allocation8], 0 }
   0x5   :  { %18 = vsyncpa [#allocation11], 0 }
   0x6   :  { %19 = vsyncpa [#allocation6], 0 }
   0x7   :  { %21 = vsyncpa [#allocation6 + $0x1], 0  ;;  %s1638_s27 = smov 0   ;;  %s1640_s28 = smov 0  }
   0x8   :  { %s1642_s29 = smov 0   ;;  %s1644_s30 = smov 0  }
   0x9 LB: > { %s1659_s9 = sadd.s32 4294967295, %s1575_s30   ;;  %s988_s10 = sadd.s32 4294967294, %s1575_s30   ;;  %s1575_s30 = sphi %s1644_s30, %s2142_s30   ;;  %s1571_s29 = sphi %s1642_s29, %s2141_s29   ;;  %s1567_s28 = sphi %s1640_s28, %s2140_s28   ;;  %s1563_s27 = sphi %s1638_s27, %s2139_s27  }
   0xa   : > { %p47_p0 = scmp.ne.s32.totalorder %s1567_s28, %s1563_s27  ;;  %p2118_p1 = scmp.eq.s32.totalorder %s1659_s9, 0 }
   0xb   : > { %p203_p3 = scmp.eq.s32.totalorder %s988_s10, 3  ;;  %p989_p5 = scmp.ge.s32.totalorder %s1575_s30, 1 }
   0xc   : > { %p1668_p4 = por %p2118_p1, %p47_p0  ;;  %p231_p7 = scmp.lt.s32.totalorder %s1575_s30, 5 }
   0xd   : > { %p1673_p6 = por %p203_p3, %p47_p0  ;;  %s1577_s14 = smov [#allocation7]  }
   0xe   : > { %s2122_s11 = scalar_select %p1668_p4, 1, 0 }
   0xf   : > { %s2123_s12 = scalar_select %p1673_p6, 1, 0 }
  0x10   : > { %p1679_p9 = pnand %p989_p5, %p231_p7  ;;  %s244_s15 = sshll.u32 %s1577_s14, 4  ;;  %s245_s15 = int_to_ptr.vmem [resolvable:$true] %s244_s15 }
  0x11   : > { %s1578_s16 = smov [#allocation9]   ;;  %s1579_s19 = smov [#allocation10]  }
  0x12   : > { %s2124_s13 = scalar_select %p1679_p9, 1, 0 }
  0x13   : > { %p1307_p10 = pneg %p1679_p9  ;;  %s257_s17 = sshll.u32 %s1578_s16, 4  ;;  %s1691_s17 = int_to_ptr.vmem [resolvable:$true] %s257_s17 }
  0x14   : > { %s1693_s20 = sshll.u32 %s1579_s19, 4  ;;  %s2126_s1 = sld [smem:[#allocation17_spill]]  ;;  %s274_s20 = int_to_ptr.vmem [resolvable:$true] %s1693_s20 }
  0x15   : > { %p1687_p11 = pnand %p1307_p10, %p2118_p1 }
  0x17   : > { %p1703_p13 = pneg %p1687_p11 }
  0x1a   : > { %s1387_s23 = scalar_lea.hbm %s2126_s1, 128 }
  0x1b   : > { %p1388_p12 = scmp.ne.s32.totalorder %s2126_s1, %s1387_s23  ;;  %p1394_p5 = scmp.lt.u32.totalorder %s1387_s23, %s2126_s1 }
  0x1d   : > { %p1390_p0 = pnand %p1703_p13, %p1388_p12 }
  0x1f   : > { %p1391_p3 = pneg %p1390_p0 }
  0x21   : > { %p1396_p7 = pnand %p1394_p5, %p1391_p3 }
  0x23   : > { %1399 = shalt.err (!%p1396_p7)
}
  0x24   : > { %s1400_s16 = scalar_lea.vmem %s245_s15, 128  ;;  %p1408_p2 = scmp.lt.s32.totalorder %s245_s15, %s245_s15 }
  0x25   : > { %p1401_p10 = scmp.ne.s32.totalorder %s245_s15, %s1400_s16  ;;  %p1409_p6 = scmp.lt.s32.totalorder %s1400_s16, %s1400_s16 }
  0x27   : > { %p1403_p8 = pnand %p1401_p10, %p1703_p13  ;;  %p1410_p4 = por %p1409_p6, %p1408_p2 }
  0x29   : > { %p1404_p1 = pneg %p1403_p8 }
  0x2b   : > { %p1411_p9 = pnand %p1410_p4, %p1404_p1 }
  0x2d   : > { %1414 = shalt.err (!%p1411_p9)
}
  0x2e   : > { %1310 = dma.hbm_to_vmem [thread:$0]  (!%p1687_p11), %s2126_s1, 128, %s245_s15, [#allocation8]  }
  0x2f   : > { %s1415_s24 = scalar_lea.hbm %s2112_s3, 4096 }
  0x30   : > { %p1416_p8 = scmp.ne.s32.totalorder %s2112_s3, %s1415_s24  ;;  %p1422_p1 = scmp.lt.u32.totalorder %s1415_s24, %s2112_s3 }
  0x32   : > { %p1418_p12 = pnand %p1416_p8, %p1703_p13 }
  0x34   : > { %p1419_p2 = pneg %p1418_p12 }
  0x36   : > { %p1424_p4 = pnand %p1422_p1, %p1419_p2 }
  0x38   : > { %1427 = shalt.err (!%p1424_p4)
}
  0x39   : > { %s1428_s15 = scalar_lea.vmem %s1691_s17, 4096  ;;  %p1436_p3 = scmp.lt.s32.totalorder %s1691_s17, %s1691_s17 }
  0x3a   : > { %p1429_p6 = scmp.ne.s32.totalorder %s1691_s17, %s1428_s15  ;;  %p1437_p5 = scmp.lt.s32.totalorder %s1428_s15, %s1428_s15 }
  0x3c   : > { %p1431_p9 = pnand %p1429_p6, %p1703_p13  ;;  %p1438_p7 = por %p1437_p5, %p1436_p3 }
  0x3e   : > { %p1432_p0 = pneg %p1431_p9 }
  0x40   : > { %p1439_p10 = pnand %p1438_p7, %p1432_p0 }
  0x42   : > { %1442 = shalt.err (!%p1439_p10)
}
  0x43   : > { %s1580_s19 = smov 128   ;;  %s1581_s21 = smov 8  }
  0x44   : > { %1313 = dma.hbm_to_vmem [thread:$0]  (!%p1687_p11), %s2112_s3, 4096, %s1691_s17, [#allocation8], %s1580_s19, %s1580_s19, %s1581_s21  }
  0x45   : > { %s1443_s10 = scalar_lea.hbm %s2114_s5, 2048 }
  0x46   : > { %p1444_p8 = scmp.ne.s32.totalorder %s2114_s5, %s1443_s10  ;;  %p1450_p1 = scmp.lt.u32.totalorder %s1443_s10, %s2114_s5 }
  0x48   : > { %p1446_p12 = pnand %p1444_p8, %p1703_p13 }
  0x4a   : > { %p1447_p2 = pneg %p1446_p12 }
  0x4c   : > { %p1452_p4 = pnand %p1450_p1, %p1447_p2 }
  0x4e   : > { %1455 = shalt.err (!%p1452_p4)
}
  0x4f   : > { %s1456_s22 = scalar_lea.vmem %s274_s20, 2048  ;;  %p1464_p3 = scmp.lt.s32.totalorder %s274_s20, %s274_s20 }
  0x50   : > { %p1457_p6 = scmp.ne.s32.totalorder %s274_s20, %s1456_s22  ;;  %p1465_p5 = scmp.lt.s32.totalorder %s1456_s22, %s1456_s22 }
  0x52   : > { %p1459_p9 = pnand %p1457_p6, %p1703_p13  ;;  %p1466_p7 = por %p1465_p5, %p1464_p3 }
  0x54   : > { %p1460_p0 = pneg %p1459_p9 }
  0x56   : > { %p1467_p10 = pnand %p1466_p7, %p1460_p0 }
  0x58   : > { %1470 = shalt.err (!%p1467_p10)
}
  0x59   : > { %1316 = dma.hbm_to_vmem [thread:$0]  (!%p1687_p11), %s2114_s5, 2048, %s274_s20, [#allocation11], %s1580_s19, %s1580_s19, %s1581_s21  }
  0x5a   : > { %s1762_s1 = sadd.s32 1, %s1575_s30   ;;  %s34_s18 = sadd.s32 1, %s1571_s29 }
  0x5b   : > { %s31_s26 = ssub.s32 %s1575_s30, %s1762_s1  ;;  %p41_p8 = scmp.ne.s32.totalorder %s1571_s29, %s1567_s28 }
  0x5c   : > { %p32_p13 = scmp.eq.s32.totalorder %s31_s26, 0  ;;  %p42_p12 = scmp.eq.s32.totalorder %s1575_s30, 0 }
  0x5d   : > { %p1328_p2 = scmp.lt.s32.totalorder %s1575_s30, 4  ;;  %p2128_p4 = scmp.eq.s32.totalorder %s1659_s9, 3 }
  0x5e   : > { %s1772_s24 = scalar_select %p32_p13, %s1571_s29, %s34_s18  }
  0x5f   : > { %p43_p1 = por %p42_p12, %p41_p8  ;;  %p1776_p6 = por %p2128_p4, %p41_p8 }
  0x60   : > { %s290_s10 = sand.u32 1, %s1571_s29   ;;  %s1018_s14 = sshll.u32 %s1575_s30, 13 }
  0x61   : > { %s994_s20 = sshll.u32 %s290_s10, 9  ;;  %s1785_s16 = scalar_lea.hbm %s2109_s0, %s1018_s14 }
  0x62   : > { %s294_s15 = scalar_lea.vmem [#allocation4], %s994_s20  ;;  %p1787_p11 = pnand %p1328_p2, %p43_p1 }
  0x63   : > { %s302_s22 = sshll.u32 %s294_s15, 4  ;;  %s1793_s23 = scalar_lea.sflag [#allocation5], %s290_s10  ;;  %s1791_s22 = int_to_ptr.vmem [resolvable:$true] %s302_s22 }
  0x64   : > { %s1471_s26 = scalar_lea.hbm %s1785_s16, 8192  ;;  %p1473_p0 = pneg %p1787_p11 }
  0x65   : > { %p1472_p9 = scmp.ne.s32.totalorder %s1785_s16, %s1471_s26  ;;  %s1476_s20 = scalar_lea.hbm %s2109_s0, 32768 }
  0x66   : > { %p1477_p7 = scmp.lt.u32.totalorder %s1785_s16, %s2109_s0  ;;  %p1478_p10 = scmp.lt.u32.totalorder %s1476_s20, %s1471_s26 }
  0x67   : > { %p1474_p3 = pnand %p1473_p0, %p1472_p9  ;;  %p1480_p8 = scmp.lt.u32.totalorder %s1471_s26, %s1785_s16 }
  0x68   : > { %p1479_p13 = por %p1478_p10, %p1477_p7 }
  0x69   : > { %p1475_p5 = pneg %p1474_p3 }
  0x6a   : > { %p1481_p12 = por %p1480_p8, %p1479_p13 }
  0x6c   : > { %p1482_p2 = pnand %p1481_p12, %p1475_p5 }
  0x6e   : > { %1485 = shalt.err (!%p1482_p2)
}
  0x6f   : > { %s1486_s10 = scalar_lea.vmem %s1791_s22, 8192  ;;  %s1582_s15 = smov [#allocation4]  }
  0x70   : > { %p1487_p1 = scmp.ne.s32.totalorder %s1791_s22, %s1486_s10  ;;  %s1491_s18 = sshll.u32 %s1582_s15, 4  ;;  %s1492_s18 = int_to_ptr.vmem [resolvable:$false] %s1491_s18 }
  0x71   : > { %s1493_s14 = scalar_lea.vmem %s1492_s18, 16384  ;;  %p1494_p3 = scmp.lt.s32.totalorder %s1791_s22, %s1492_s18 }
  0x72   : > { %p1489_p4 = pnand %p1487_p1, %p1473_p0  ;;  %p1495_p7 = scmp.lt.s32.totalorder %s1493_s14, %s1486_s10 }
  0x74   : > { %p1490_p9 = pneg %p1489_p4  ;;  %p1496_p10 = por %p1495_p7, %p1494_p3 }
  0x76   : > { %p1497_p13 = pnand %p1496_p10, %p1490_p9 }
  0x78   : > { %1500 = shalt.err (!%p1497_p13)
}
  0x79   : > { %s1583_s26 = smov 256   ;;  %s1584_s20 = smov 16  }
  0x7a   : > { %1320 = dma.hbm_to_vmem [thread:$0]  (!%p1787_p11), %s1785_s16, 8192, %s1791_s22, %s1793_s23, %s1583_s26, %s1583_s26, %s1584_s20  }
  0x7b   : > { %p2131_p0 = scmp.ne.s32.totalorder %s2124_s13, 0 }
  0x7c   : > { %s1824_s19 = sand.u32 (!%p2131_p0), 1, %s1567_s28   ;;  %p2132_p5 = scmp.ne.s32.totalorder (!%p2131_p0), %s2122_s11, 0 }
  0x7d   : > { %314 = sbr.rel (%p2131_p0) target bundleno = 1634 (0x662), region = 48  ;;  %s999_s21 = sshll.u32 (!%p2131_p0), %s1824_s19, 9 }
  0x7e   : > { %s317_s10 = scalar_lea.sflag (!%p2131_p0), [#allocation5], %s1824_s19  ;;  %s1828_s15 = scalar_lea.vmem (!%p2131_p0), [#allocation4], %s999_s21 }
  0x84   : > { %1546 = dma.done.wait (%p2132_p5), %s317_s10, 8192  }
  0x85   : > { %1548 = vsyncadd (%p2132_p5), %s317_s10, 4294959104  ;;  %p2133_p11 = scmp.eq.s32.totalorder %s1659_s9, 0 }
  0x87   : > { %1550 = dma.done.wait (%p2133_p11), [#allocation8], 4224   ;;  %p2134_p8 = pmov %p2133_p11 }
  0x89   : > { %1552 = vsyncadd (%p2134_p8), [#allocation8], 4294963072  ;;  %p2135_p12 = pmov %p2134_p8 }
  0x8a   : > { %p2136_p2 = pmov %p2134_p8 }
  0x8b   : > { %1554 = dma.done.wait (%p2135_p12), [#allocation11], 2048  }
  0x8c   : > { %1556 = vsyncadd (%p2136_p2), [#allocation11], 4294965248  ;;  %v368_v0 = vld [vmem:[%s1828_s15 + $0x8] sm:$0xff]  ;;  %v370_v1 = vld [vmem:[%s1828_s15 + $0x18] sm:$0xff]  ;;  %v1585_v9 = vmov 0   ;;  %s1003_s16 = sshll.u32 %s1824_s19, 3 }
  0x8d   : > { %v367_v2 = vld [vmem:[%s1828_s15] sm:$0xff]  ;;  %v1845_v3 = vpack.c.bf16 %v370_v1, %v368_v0  ;;  %v369_v4 = vld [vmem:[%s1828_s15 + $0x10] sm:$0xff]  ;;  %v372_v5 = vld [vmem:[%s1828_s15 + $0x28] sm:$0xff]  ;;  %1379 = vset.pattern.permute.xlu0 %v1585_v9  ;;  %s2003_s22 = scalar_lea.vmem [#allocation12], %s1003_s16  ;;  %p2137_p1 = scmp.ne.s32.totalorder %s1659_s9, 0 }
  0x8e   : > { %v374_v6 = vld [vmem:[%s1828_s15 + $0x38] sm:$0xff]  ;;  %v1850_v7 = vpack.c.bf16 %v369_v4, %v367_v2  ;;  %v371_v10 = vld [vmem:[%s1828_s15 + $0x20] sm:$0xff]  ;;  %v373_v11 = vld [vmem:[%s1828_s15 + $0x30] sm:$0xff]  ;;  %vm521_vm0 = vcmask (!%p2137_p1), 3072  }
  0x8f   : > { %v1852_v8 = vpack.c.bf16 %v374_v6, %v372_v5  ;;  %1108 = vmatprep.subr.bf16.mxu0 %v1845_v3  ;;  %v376_v12 = vld [vmem:[%s1828_s15 + $0x48] sm:$0xff]  ;;  %v378_v13 = vld [vmem:[%s1828_s15 + $0x58] sm:$0xff]  ;;  %v1862_v14 = vpack.c.bf16 %v373_v11, %v371_v10  ;;  %v375_v16 = vld [vmem:[%s1828_s15 + $0x40] sm:$0xff] }
  0x90   : > { %1110 = vmatpush1.bf16.xpose.msra.mxu0 %v1850_v7  ;;  %v1864_v15 = vpack.c.bf16 %v378_v13, %v376_v12  ;;  %v377_v17 = vld [vmem:[%s1828_s15 + $0x50] sm:$0xff]  ;;  %v380_v18 = vld [vmem:[%s1828_s15 + $0x68] sm:$0xff]  ;;  %v382_v19 = vld [vmem:[%s1828_s15 + $0x78] sm:$0xff] }
  0x91   : > { %1112 = vmatprep.subr.bf16.mxu0 %v1852_v8  ;;  %v1872_v20 = vpack.c.bf16 %v377_v17, %v375_v16  ;;  %v1874_v21 = vpack.c.bf16 %v382_v19, %v380_v18  ;;  %v379_v22 = vld [vmem:[%s1828_s15 + $0x60] sm:$0xff]  ;;  %v381_v23 = vld [vmem:[%s1828_s15 + $0x70] sm:$0xff]  ;;  %v384_v26 = vld [vmem:[%s1828_s15 + $0x88] sm:$0xff] }
  0x92   : > { %v1880_v24 = vld [vmem:[#allocation7] sm:$0xff]  ;;  %v432_v25 = vld [vmem:[%s2111_s2] sm:$0xf]  ;;  %v386_v27 = vld [vmem:[%s1828_s15 + $0x98] sm:$0xff]  ;;  %v1889_v29 = vpack.c.bf16 %v381_v23, %v379_v22 }
  0x93   : > { %v439_v28 = vcombine.high %v1880_v24, %v1880_v24  ;;  %435 = vperm.xlu0 %1379, %v432_v25   ;;  %v1891_v30 = vpack.c.bf16 %v386_v27, %v384_v26  ;;  %v383_v31 = vld [vmem:[%s1828_s15 + $0x80] sm:$0xff]  ;;  %v385_v32 = vld [vmem:[%s1828_s15 + $0x90] sm:$0xff]  ;;  %v388_v33 = vld [vmem:[%s1828_s15 + $0xa8] sm:$0xff] }
  0x94   : > { %v390_v34 = vld [vmem:[%s1828_s15 + $0xb8] sm:$0xff]  ;;  %v1899_v35 = vpack.c.bf16 %v385_v32, %v383_v31  ;;  %v387_v37 = vld [vmem:[%s1828_s15 + $0xa0] sm:$0xff]  ;;  %v389_v38 = vld [vmem:[%s1828_s15 + $0xb0] sm:$0xff] }
  0x95   : > { %505 = vmatprep.mubr.f32.mxu0 %v439_v28  ;;  %v1901_v36 = vpack.c.bf16 %v390_v34, %v388_v33  ;;  %v392_v39 = vld [vmem:[%s1828_s15 + $0xc8] sm:$0xff]  ;;  %v394_v40 = vld [vmem:[%s1828_s15 + $0xd8] sm:$0xff]  ;;  %v1909_v41 = vpack.c.bf16 %v389_v38, %v387_v37  ;;  %v391_v43 = vld [vmem:[%s1828_s15 + $0xc0] sm:$0xff] }
  0x96   : > { %v1911_v42 = vpack.c.bf16 %v394_v40, %v392_v39  ;;  %v393_v44 = vld [vmem:[%s1828_s15 + $0xd0] sm:$0xff]  ;;  %v396_v45 = vld [vmem:[%s1828_s15 + $0xe8] sm:$0xff]  ;;  %v398_v46 = vld [vmem:[%s1828_s15 + $0xf8] sm:$0xff] }
  0x97   : > { %v1919_v47 = vpack.c.bf16 %v393_v44, %v391_v43  ;;  %v1921_v48 = vpack.c.bf16 %v398_v46, %v396_v45  ;;  %v395_v49 = vld [vmem:[%s1828_s15 + $0xe0] sm:$0xff]  ;;  %v397_v50 = vld [vmem:[%s1828_s15 + $0xf0] sm:$0xff]  ;;  %v400_v51 = vld [vmem:[%s1828_s15 + $0x108] sm:$0xff] }
  0x98   : > { %1114 = vmatpush1.bf16.xpose.msra.mxu0 %v1862_v14  ;;  %v402_v52 = vld [vmem:[%s1828_s15 + $0x118] sm:$0xff]  ;;  %v1929_v53 = vpack.c.bf16 %v397_v50, %v395_v49  ;;  %v399_v55 = vld [vmem:[%s1828_s15 + $0x100] sm:$0xff]  ;;  %v401_v56 = vld [vmem:[%s1828_s15 + $0x110] sm:$0xff] }
  0x99   : > { %1116 = vmatprep.subr.bf16.mxu0 %v1864_v15  ;;  %v1931_v54 = vpack.c.bf16 %v402_v52, %v400_v51  ;;  %v404_v57 = vld [vmem:[%s1828_s15 + $0x128] sm:$0xff]  ;;  %v406_v58 = vld [vmem:[%s1828_s15 + $0x138] sm:$0xff]  ;;  %v1939_v59 = vpack.c.bf16 %v401_v56, %v399_v55  ;;  %v403_v61 = vld [vmem:[%s1828_s15 + $0x120] sm:$0xff] }
  0x9a   : > { %v1941_v60 = vpack.c.bf16 %v406_v58, %v404_v57  ;;  %v405_v62 = vld [vmem:[%s1828_s15 + $0x130] sm:$0xff]  ;;  %v408_v63 = vld [vmem:[%s1828_s15 + $0x148] sm:$0xff]  ;;  %v410_v0 = vld [vmem:[%s1828_s15 + $0x158] sm:$0xff] }
  0x9b   : > { %v1949_v1 = vpack.c.bf16 %v405_v62, %v403_v61  ;;  %v1951_v2 = vpack.c.bf16 %v410_v0, %v408_v63  ;;  %v407_v4 = vld [vmem:[%s1828_s15 + $0x140] sm:$0xff]  ;;  %v409_v5 = vld [vmem:[%s1828_s15 + $0x150] sm:$0xff]  ;;  %v412_v6 = vld [vmem:[%s1828_s15 + $0x168] sm:$0xff]  ;;  %v1586_v63 = vmov (!%p2137_p1), -inf   ;;  %v1587_v0 = vmov (!%p2137_p1), 0.0  }
  0x9c   : > { %v414_v10 = vld [vmem:[%s1828_s15 + $0x178] sm:$0xff]  ;;  %v1959_v11 = vpack.c.bf16 %v409_v5, %v407_v4  ;;  %v411_v13 = vld [vmem:[%s1828_s15 + $0x160] sm:$0xff]  ;;  %v413_v16 = vld [vmem:[%s1828_s15 + $0x170] sm:$0xff]  ;;  %522 = vst.msk [vmem:[#allocation2] sm:$0xf] (!%p2137_p1), %vm521_vm0, %v1586_v63 }
  0x9d   : > { %v1961_v12 = vpack.c.bf16 %v414_v10, %v412_v6  ;;  %v416_v17 = vld [vmem:[%s1828_s15 + $0x188] sm:$0xff]  ;;  %v418_v18 = vld [vmem:[%s1828_s15 + $0x198] sm:$0xff]  ;;  %v1969_v19 = vpack.c.bf16 %v413_v16, %v411_v13  ;;  %v415_v23 = vld [vmem:[%s1828_s15 + $0x180] sm:$0xff]  ;;  %523 = vst [vmem:[#allocation3] sm:$0xff] (!%p2137_p1), %v1587_v0 }
  0x9e   : > { %v1971_v22 = vpack.c.bf16 %v418_v18, %v416_v17  ;;  %v417_v25 = vld [vmem:[%s1828_s15 + $0x190] sm:$0xff]  ;;  %v420_v26 = vld [vmem:[%s1828_s15 + $0x1a8] sm:$0xff]  ;;  %v422_v27 = vld [vmem:[%s1828_s15 + $0x1b8] sm:$0xff] }
  0x9f   : > { %v1979_v28 = vpack.c.bf16 %v417_v25, %v415_v23  ;;  %v1981_v31 = vpack.c.bf16 %v422_v27, %v420_v26  ;;  %v419_v32 = vld [vmem:[%s1828_s15 + $0x1a0] sm:$0xff]  ;;  %v421_v33 = vld [vmem:[%s1828_s15 + $0x1b0] sm:$0xff]  ;;  %v424_v34 = vld [vmem:[%s1828_s15 + $0x1c8] sm:$0xff] }
  0xa0   : > { %1118 = vmatpush1.bf16.xpose.msra.mxu0 %v1872_v20  ;;  %v426_v37 = vld [vmem:[%s1828_s15 + $0x1d8] sm:$0xff]  ;;  %v1989_v38 = vpack.c.bf16 %v421_v33, %v419_v32  ;;  %v423_v40 = vld [vmem:[%s1828_s15 + $0x1c0] sm:$0xff]  ;;  %v425_v43 = vld [vmem:[%s1828_s15 + $0x1d0] sm:$0xff] }
  0xa1   : > { %1120 = vmatprep.subr.bf16.mxu0 %v1874_v21  ;;  %v1991_v39 = vpack.c.bf16 %v426_v37, %v424_v34  ;;  %v428_v44 = vld [vmem:[%s1828_s15 + $0x1e8] sm:$0xff]  ;;  %v430_v45 = vld [vmem:[%s1828_s15 + $0x1f8] sm:$0xff]  ;;  %v1165_v46 = vpack.c.bf16 %v425_v43, %v423_v40  ;;  %v427_v50 = vld [vmem:[%s1828_s15 + $0x1e0] sm:$0xff] }
  0xa2   : > { %v1167_v49 = vpack.c.bf16 %v430_v45, %v428_v44  ;;  %v429_v51 = vld [vmem:[%s1828_s15 + $0x1f0] sm:$0xff] }
  0xa3   : > { %v1169_v52 = vpack.c.bf16 %v429_v51, %v427_v50 }
  0xa8   : > { %1122 = vmatpush1.bf16.xpose.msra.mxu0 %v1889_v29 }
  0xa9   : > { %1124 = vmatprep.subr.bf16.mxu0 %v1891_v30 }
  0xb0   : > { %1126 = vmatpush1.bf16.xpose.msra.mxu0 %v1899_v35 }
  0xb1   : > { %1128 = vmatprep.subr.bf16.mxu0 %v1901_v36 }
  0xb8   : > { %1130 = vmatpush1.bf16.xpose.msra.mxu0 %v1909_v41 }
  0xb9   : > { %1132 = vmatprep.subr.bf16.mxu0 %v1911_v42 }
  0xc0   : > { %1134 = vmatpush1.bf16.xpose.msra.mxu0 %v1919_v47 }
  0xc1   : > { %1136 = vmatprep.subr.bf16.mxu0 %v1921_v48 }
  0xc8   : > { %1138 = vmatpush1.bf16.xpose.msra.mxu0 %v1929_v53 }
  0xc9   : > { %1140 = vmatprep.subr.bf16.mxu0 %v1931_v54 }
  0xd0   : > { %1142 = vmatpush1.bf16.xpose.msra.mxu0 %v1939_v59 }
  0xd1   : > { %1144 = vmatprep.subr.bf16.mxu0 %v1941_v60 }
  0xd8   : > { %1146 = vmatpush1.bf16.xpose.msra.mxu0 %v1949_v1 }
  0xd9   : > { %1148 = vmatprep.subr.bf16.mxu0 %v1951_v2 }
  0xe0   : > { %1150 = vmatpush1.bf16.xpose.msra.mxu0 %v1959_v11 }
  0xe1   : > { %1152 = vmatprep.subr.bf16.mxu0 %v1961_v12 }
  0xe8   : > { %1154 = vmatpush1.bf16.xpose.msra.mxu0 %v1969_v19 }
  0xe9   : > { %1156 = vmatprep.subr.bf16.mxu0 %v1971_v22 }
  0xf0   : > { %1158 = vmatpush1.bf16.xpose.msra.mxu0 %v1979_v28 }
  0xf1   : > { %1160 = vmatprep.subr.bf16.mxu0 %v1981_v31 }
  0xf8   : > { %1162 = vmatpush1.bf16.xpose.msra.mxu0 %v1989_v38 }
  0xf9   : > { %1164 = vmatprep.subr.bf16.mxu0 %v1991_v39 }
 0x100   : > { %1166 = vmatpush1.bf16.xpose.msra.mxu0 %v1165_v46 }
 0x101   : > { %1168 = vmatprep.subr.bf16.mxu0 %v1167_v49 }
 0x108   : > { %1170 = vmatpush1.bf16.xpose.msra.mxu0 %v1169_v52 }
 0x10f   : > { %506 = vmatmul.mubr.f32.vlgmr.msra.gmra.mrb[0].mxu0 %v1880_v24 }
 0x112   : > { %v436_v55 = vpop.permute.xlu0 %435 }
 0x1e2   : > { %v507_v56 = vpop.f32.mrb[0].mxu0  ;;  %520 = sbr.rel (%p2137_p1) target bundleno = 489 (0x1e9), region = 68 }
 0x1e3   : > { %v508_v57 = vadd.f32 %v507_v56, %v436_v55  ;;  %v509_v58 = vpop.f32.mrb[1].mxu0 }
 0x1e4   : > { %v510_v61 = vadd.f32 %v509_v58, %v436_v55 }
 0x1e6   : > { %v514_v62 = vcombine.low %v508_v57, %v510_v61 }
 0x1e8   : > { %516 = vst [vmem:[%s2003_s22] sm:$0xff] %v514_v62 }
 0x1e9 PF: > { %vm527_vm1 = vcmask 1043456   ;;  %1381 = vset.pattern.permute.xlu1 %v1585_v9  ;;  %1172 = vmatprep.subr.bf16.mxu1 %v1845_v3  ;;  %v524_v3 = vlaneseq  ;;  %vm652_vm2 = vcmask 3072   ;;  %v634_v13 = vld [vmem:[#allocation3] sm:$0xff]  ;;  %p1009_p4 = scmp.ne.s32.totalorder %s1659_s9, 3 }
 0x1ea   : > { %v528_v24 = vsel %vm527_vm1, %v508_v57, -inf  ;;  %v529_v4 = vsel %vm527_vm1, %v510_v61, -inf  ;;  %1174 = vmatpush1.bf16.msra.mxu1 %v1850_v7  ;;  %1382 = vset.pattern.permute.xlu0 %v1585_v9  ;;  %v641_v17 = vcombine.high %v634_v13, %v634_v13  ;;  %v675_v25 = vld [vmem:[#allocation9 + $0x80] sm:$0xff] (!%p1009_p4)  ;;  %v676_v26 = vld [vmem:[#allocation9 + $0x88] sm:$0xff] (!%p1009_p4)  ;;  %v677_v32 = vld [vmem:[#allocation9 + $0x90] sm:$0xff] (!%p1009_p4)  ;;  %v1589_v34 = vmov (!%p1009_p4), 0.0|0.0  }
 0x1eb   : > { %v530_v5 = vmax.f32 %v528_v24, %v529_v4  ;;  %1176 = vmatprep.subr.bf16.mxu1 %v1852_v8  ;;  %v525_v7 = vand.u32 127, %v524_v3  ;;  %v650_v8 = vld [vmem:[#allocation2] sm:$0xf]  ;;  %v659_v27 = vld [vmem:[#allocation9] sm:$0xff] (!%p1009_p4)  ;;  %v678_v33 = vld [vmem:[#allocation9 + $0x98] sm:$0xff] (!%p1009_p4)  ;;  %vm1590_vm11 = vmmov (!%p1009_p4), 0  }
 0x1ec   : > { %v662_v40 = vld [vmem:[#allocation9 + $0x18] sm:$0xff] (!%p1009_p4)  ;;  %v679_v43 = vld [vmem:[#allocation9 + $0xa0] sm:$0xff] (!%p1009_p4)  ;;  %v680_v44 = vld [vmem:[#allocation9 + $0xa8] sm:$0xff] (!%p1009_p4) }
 0x1ed   : > { %531 = vmax.xlane.f32.xlu0 %v530_v5  ;;  %v664_v50 = vld [vmem:[#allocation9 + $0x28] sm:$0xff] (!%p1009_p4)  ;;  %v681_v51 = vld [vmem:[#allocation9 + $0xb0] sm:$0xff] (!%p1009_p4)  ;;  %v666_v58 = vld [vmem:[#allocation9 + $0x38] sm:$0xff] (!%p1009_p4) }
 0x1ee   : > { %1178 = vmatpush1.bf16.msra.mxu1 %v1862_v14  ;;  %v526_v14 = vadd.s32 128, %v525_v7  ;;  %v684_v62 = vld [vmem:[#allocation9 + $0xc8] sm:$0xff] (!%p1009_p4)  ;;  %v772_v24 = vld [vmem:[#allocation10] sm:$0xff] (!%p1009_p4)  ;;  %v774_v5 = vld [vmem:[#allocation10 + $0x10] sm:$0xff] (!%p1009_p4) }
 0x1ef   : > { %1180 = vmatprep.subr.bf16.mxu1 %v1864_v15  ;;  %v773_v4 = vld [vmem:[#allocation10 + $0x8] sm:$0xff] (!%p1009_p4) }
 0x1f2   : > { %1182 = vmatpush1.bf16.msra.mxu1 %v1872_v20 }
 0x1f3   : > { %1184 = vmatprep.subr.bf16.mxu1 %v1874_v21 }
 0x1f6   : > { %1186 = vmatpush1.bf16.msra.mxu1 %v1889_v29 }
 0x1f7   : > { %1188 = vmatprep.subr.bf16.mxu1 %v1891_v30  ;;  %v632_v30 = vld [vmem:[#allocation2] sm:$0xf] }
 0x1fa   : > { %1190 = vmatpush1.bf16.msra.mxu1 %v1899_v35 }
 0x1fb   : > { %1192 = vmatprep.subr.bf16.mxu1 %v1901_v36 }
 0x1fe   : > { %1194 = vmatpush1.bf16.msra.mxu1 %v1909_v41 }
 0x1ff   : > { %1196 = vmatprep.subr.bf16.mxu1 %v1911_v42 }
 0x202   : > { %1198 = vmatpush1.bf16.msra.mxu1 %v1919_v47 }
 0x203   : > { %1200 = vmatprep.subr.bf16.mxu1 %v1921_v48 }
 0x206   : > { %1202 = vmatpush1.bf16.msra.mxu1 %v1929_v53 }
 0x207   : > { %1204 = vmatprep.subr.bf16.mxu1 %v1931_v54 }
 0x20a   : > { %1206 = vmatpush1.bf16.msra.mxu1 %v1939_v59 }
 0x20b   : > { %1208 = vmatprep.subr.bf16.mxu1 %v1941_v60 }
 0x20e   : > { %1210 = vmatpush1.bf16.msra.mxu1 %v1949_v1 }
 0x20f   : > { %1212 = vmatprep.subr.bf16.mxu1 %v1951_v2 }
 0x212   : > { %1214 = vmatpush1.bf16.msra.mxu1 %v1959_v11 }
 0x213   : > { %1216 = vmatprep.subr.bf16.mxu1 %v1961_v12  ;;  %v1588_v12 = vmov 1.0  }
 0x216   : > { %1218 = vmatpush1.bf16.msra.mxu1 %v1969_v19 }
 0x217   : > { %1220 = vmatprep.subr.bf16.mxu1 %v1971_v22 }
 0x21a   : > { %1222 = vmatpush1.bf16.msra.mxu1 %v1979_v28  ;;  %v1235_v28 = vpack.c.bf16 (!%p1009_p4), %v676_v26, %v675_v25  ;;  %v782_v26 = vld [vmem:[#allocation10 + $0x50] sm:$0xff] (!%p1009_p4) }
 0x21b   : > { %1224 = vmatprep.subr.bf16.mxu1 %v1981_v31  ;;  %v660_v31 = vld [vmem:[#allocation9 + $0x8] sm:$0xff] (!%p1009_p4) }
 0x21c   : > { %v1237_v37 = vpack.c.bf16 (!%p1009_p4), %v660_v31, %v659_v27  ;;  %1236 = vmatprep.subr.bf16.mxu0 (!%p1009_p4), %v1235_v28  ;;  %v783_v27 = vld [vmem:[#allocation10 + $0x58] sm:$0xff] (!%p1009_p4) }
 0x21d   : > { %v1283_v31 = vpack.c.bf16 (!%p1009_p4), %v783_v27, %v782_v26 }
 0x21e   : > { %1226 = vmatpush1.bf16.msra.mxu1 %v1989_v38  ;;  %v1239_v38 = vpack.c.bf16 (!%p1009_p4), %v678_v33, %v677_v32  ;;  %1238 = vmatpush3.bf16.msra.mxu0 (!%p1009_p4), %v1237_v37  ;;  %v784_v32 = vld [vmem:[#allocation10 + $0x60] sm:$0xff] (!%p1009_p4)  ;;  %v785_v33 = vld [vmem:[#allocation10 + $0x68] sm:$0xff] (!%p1009_p4) }
 0x21f   : > { %1228 = vmatprep.subr.bf16.mxu1 %v1991_v39  ;;  %v661_v39 = vld [vmem:[#allocation9 + $0x10] sm:$0xff] (!%p1009_p4)  ;;  %v1286_v37 = vpack.c.bf16 (!%p1009_p4), %v785_v33, %v784_v32 }
 0x220   : > { %v1241_v45 = vpack.c.bf16 (!%p1009_p4), %v662_v40, %v661_v39  ;;  %1240 = vmatprep.subr.bf16.mxu0 (!%p1009_p4), %v1239_v38  ;;  %v786_v38 = vld [vmem:[#allocation10 + $0x70] sm:$0xff] (!%p1009_p4)  ;;  %v787_v39 = vld [vmem:[#allocation10 + $0x78] sm:$0xff] (!%p1009_p4) }
 0x221   : > { %v1289_v40 = vpack.c.bf16 (!%p1009_p4), %v787_v39, %v786_v38 }
 0x222   : > { %1230 = vmatpush1.bf16.msra.mxu1 %v1165_v46  ;;  %v1243_v46 = vpack.c.bf16 (!%p1009_p4), %v680_v44, %v679_v43  ;;  %1242 = vmatpush3.bf16.msra.mxu0 (!%p1009_p4), %v1241_v45  ;;  %v1591_v43 = vmov (!%p1009_p4), 0.0   ;;  %v1010_v45 = vld [vmem:[%s2113_s4] ss:$0 sm:$0xff] (!%p1009_p4) }
 0x223   : > { %1232 = vmatprep.subr.bf16.mxu1 %v1167_v49  ;;  %v663_v49 = vld [vmem:[#allocation9 + $0x20] sm:$0xff] (!%p1009_p4) }
 0x224   : > { %v1245_v55 = vpack.c.bf16 (!%p1009_p4), %v664_v50, %v663_v49  ;;  %1244 = vmatprep.subr.bf16.mxu0 (!%p1009_p4), %v1243_v46 }
 0x226   : > { %1234 = vmatpush1.bf16.msra.mxu1 %v1169_v52  ;;  %v682_v52 = vld [vmem:[#allocation9 + $0xb8] sm:$0xff] (!%p1009_p4)  ;;  %1246 = vmatpush3.bf16.msra.mxu0 (!%p1009_p4), %v1245_v55 }
 0x227   : > { %1267 = vmatprep.subr.bf16.mxu1 (!%p1009_p4), %v1589_v34  ;;  %v1247_v56 = vpack.c.bf16 (!%p1009_p4), %v682_v52, %v681_v51 }
 0x229   : > { %1248 = vmatprep.subr.bf16.mxu0 (!%p1009_p4), %v1247_v56 }
 0x27a   : > { %v532_v15 = vpop.xlane.xlu0 %531 }
 0x27b   : > { %vm533_vm3 = vcmp.eq.f32.partialorder %v508_v57, %v532_v15  ;;  %vm534_vm4 = vcmp.eq.f32.partialorder %v510_v61, %v532_v15  ;;  %v651_v20 = vmax.f32 %v650_v8, %v532_v15  ;;  %vm633_vm7 = vcmp.gt.f32.partialorder %v532_v15, %v632_v30  ;;  %v665_v57 = vld [vmem:[#allocation9 + $0x30] sm:$0xff] (!%p1009_p4)  ;;  %v683_v61 = vld [vmem:[#allocation9 + $0xc0] sm:$0xff] (!%p1009_p4)  ;;  %v775_v8 = vld [vmem:[#allocation10 + $0x18] sm:$0xff] (!%p1009_p4) }
 0x27c   : > { %v535_v21 = vsel %vm533_vm3, %v525_v7, 256  ;;  %v536_v29 = vsel %vm534_vm4, %v526_v14, 256  ;;  %v635_v60 = vsel %vm633_vm7, 1, %v1585_v9  ;;  %v1249_v3 = vpack.c.bf16 (!%p1009_p4), %v666_v58, %v665_v57  ;;  %v667_v15 = vld [vmem:[#allocation9 + $0x40] sm:$0xff] (!%p1009_p4) }
 0x27d   : > { %v537_v35 = vsel %vm527_vm1, %v535_v21, 2147483647  ;;  %v538_v36 = vsel %vm527_vm1, %v536_v29, 2147483647  ;;  %653 = vst.msk [vmem:[#allocation2] sm:$0xf] %vm652_vm2, %v651_v20  ;;  %v1271_v30 = vpack.c.bf16 (!%p1009_p4), %v775_v8, %v774_v5 }
 0x27e   : > { %vm539_vm5 = vcmp.lt.s32.totalorder %v537_v35, %v538_v36  ;;  %v668_v20 = vld [vmem:[#allocation9 + $0x48] sm:$0xff] (!%p1009_p4)  ;;  %v685_v21 = vld [vmem:[#allocation9 + $0xd0] sm:$0xff] (!%p1009_p4)  ;;  %v686_v29 = vld [vmem:[#allocation9 + $0xd8] sm:$0xff] (!%p1009_p4)  ;;  %1250 = vmatpush3.bf16.msra.mxu0 (!%p1009_p4), %v1249_v3 }
 0x27f   : > { %v540_v41 = vsel %vm539_vm5, %v537_v35, %v538_v36  ;;  %v776_v35 = vld [vmem:[#allocation10 + $0x20] sm:$0xff] (!%p1009_p4)  ;;  %v777_v36 = vld [vmem:[#allocation10 + $0x28] sm:$0xff] (!%p1009_p4) }
 0x280   : > { %v542_v42 = vshra.s32 %v540_v41, 16  ;;  %v541_v48 = vand.u32 65535, %v540_v41  ;;  %v1253_v41 = vpack.c.bf16 (!%p1009_p4), %v668_v20, %v667_v15 }
 0x282   : > { %v544_v47 = vcvt.s32.f32 %v542_v42  ;;  %v543_v54 = vcvt.s32.f32 %v541_v48  ;;  %v1255_v42 = vpack.c.bf16 (!%p1009_p4), %v686_v29, %v685_v21  ;;  %v670_v48 = vld [vmem:[#allocation9 + $0x58] sm:$0xff] (!%p1009_p4) }
 0x284   : > { %545 = vmin.xlane.f32.xlu0 %v544_v47 }
 0x311   : > { %v546_v53 = vpop.xlane.xlu0 %545 }
 0x312   : > { %vm547_vm6 = vcmp.eq.f32.partialorder %v544_v47, %v546_v53  ;;  %v552_v1 = vcvt.f32.s32 %v546_v53  ;;  %v669_v47 = vld [vmem:[#allocation9 + $0x50] sm:$0xff] (!%p1009_p4)  ;;  %v687_v53 = vld [vmem:[#allocation9 + $0xe0] sm:$0xff] (!%p1009_p4) }
 0x313   : > { %v548_v59 = vsel %vm547_vm6, %v543_v54, inf  ;;  %v688_v54 = vld [vmem:[#allocation9 + $0xe8] sm:$0xff] (!%p1009_p4) }
 0x314   : > { %549 = vmin.xlane.f32.xlu1 %v548_v59  ;;  %v553_v6 = vshll.u32 %v552_v1, 16  ;;  %v1274_v59 = vpack.c.bf16 (!%p1009_p4), %v777_v36, %v776_v35  ;;  %v779_v1 = vld [vmem:[#allocation10 + $0x38] sm:$0xff] (!%p1009_p4) }
 0x325   : > { %637 = vperm.xlu1 %1381, %v635_v60   ;;  %v778_v60 = vld [vmem:[#allocation10 + $0x30] sm:$0xff] (!%p1009_p4) }
 0x3a1   : > { %v550_v2 = vpop.xlane.xlu1 %549 }
 0x3a2   : > { %v551_v10 = vcvt.f32.s32 %v550_v2  ;;  %v1257_v2 = vpack.c.bf16 (!%p1009_p4), %v670_v48, %v669_v47 }
 0x3a4   : > { %v554_v11 = vadd.s32 %v553_v6, %v551_v10  ;;  %v1259_v6 = vpack.c.bf16 (!%p1009_p4), %v688_v54, %v687_v53  ;;  %v671_v10 = vld [vmem:[#allocation9 + $0x60] sm:$0xff] (!%p1009_p4) }
 0x3a5   : > { %v638_v16 = vpop.permute.xlu1 %637 }
 0x3a6   : > { %vm556_vm8 = vcmp.eq.s32.totalorder %v526_v14, %v554_v11  ;;  %vm555_vm9 = vcmp.eq.s32.totalorder %v525_v7, %v554_v11  ;;  %vm639_vm10 = vcmp.eq.s32.totalorder %v638_v16, 1  ;;  %v1268_v7 = vpack.c.bf16 (!%p1009_p4), %v773_v4, %v772_v24  ;;  %v672_v11 = vld [vmem:[#allocation9 + $0x68] sm:$0xff] (!%p1009_p4) }
 0x3a7   : > { %1007 = vmatprep.mubr.msk.f32.mxu1 %vm556_vm8, %v1588_v12  ;;  %v1251_v14 = vpack.c.bf16 (!%p1009_p4), %v684_v62, %v683_v61  ;;  %v1277_v16 = vpack.c.bf16 (!%p1009_p4), %v779_v1, %v778_v60 }
 0x3a8   : > { %1008 = vmatmul.mubr.msk.f32.vlgmr.msra.gmra.mrb[0].mxu1 %vm555_vm9, %v1588_v12  ;;  %v689_v12 = vld [vmem:[#allocation9 + $0xf0] sm:$0xff] (!%p1009_p4) }
 0x3a9   : > { %1269 = vmatpush3.bf16.msra.mxu1 (!%p1009_p4), %v1268_v7  ;;  %1252 = vmatprep.subr.bf16.mxu0 (!%p1009_p4), %v1251_v14 }
 0x3aa   : > { %1270 = vmatprep.subr.bf16.mxu1 (!%p1009_p4), %v1589_v34  ;;  %1254 = vmatpush3.bf16.msra.mxu0 (!%p1009_p4), %v1253_v41 }
 0x3ab   : > { %1256 = vmatprep.subr.bf16.mxu0 (!%p1009_p4), %v1255_v42  ;;  %1104 = vmatprep.mubr.msk.f32.mxu1 (!%p1009_p4), %vm1590_vm11, %v1591_v43 }
 0x3ad   : > { %1272 = vmatpush3.bf16.msra.mxu1 (!%p1009_p4), %v1271_v30 }
 0x3ae   : > { %1273 = vmatprep.subr.bf16.mxu1 (!%p1009_p4), %v1589_v34  ;;  %1258 = vmatpush3.bf16.msra.mxu0 (!%p1009_p4), %v1257_v2 }
 0x3af   : > { %1260 = vmatprep.subr.bf16.mxu0 (!%p1009_p4), %v1259_v6 }
 0x3b1   : > { %1275 = vmatpush3.bf16.msra.mxu1 (!%p1009_p4), %v1274_v59 }
 0x3b2   : > { %1276 = vmatprep.subr.bf16.mxu1 (!%p1009_p4), %v1589_v34 }
 0x3b5   : > { %1278 = vmatpush3.bf16.msra.mxu1 (!%p1009_p4), %v1277_v16 }
 0x3b6   : > { %1279 = vmatprep.subr.bf16.mxu1 (!%p1009_p4), %v1589_v34 }
 0x47a   : > { %657 = sbr.rel (%p1009_p4) target bundleno = 1610 (0x64a), region = 72 }
 0x47b   : > { %v627_v18 = vpop.f32.mrb[0].mxu1 }
 0x47c   : > { %v643_v19 = vsel %vm639_vm10, %v627_v18, %v634_v13  ;;  %v629_v22 = vpop.f32.mrb[1].mxu1  ;;  %v690_v13 = vld [vmem:[#allocation9 + $0xf8] sm:$0xff] (!%p1009_p4)  ;;  %v781_v18 = vld [vmem:[#allocation10 + $0x48] sm:$0xff] (!%p1009_p4) }
 0x47d   : > { %v644_v23 = vsel %vm639_vm10, %v629_v22, %v641_v17  ;;  %v780_v17 = vld [vmem:[#allocation10 + $0x40] sm:$0xff] (!%p1009_p4)  ;;  %v1263_v22 = vpack.c.bf16 (!%p1009_p4), %v690_v13, %v689_v12 }
 0x47e   : > { %v647_v9 = vcombine.low %v643_v19, %v644_v23  ;;  %v1261_v19 = vpack.c.bf16 (!%p1009_p4), %v672_v11, %v671_v10  ;;  %v673_v23 = vld [vmem:[#allocation9 + $0x70] sm:$0xff] (!%p1009_p4)  ;;  %v1280_v25 = vpack.c.bf16 (!%p1009_p4), %v781_v18, %v780_v17 }
 0x480   : > { %649 = vst [vmem:[#allocation3] sm:$0xff] %v647_v9  ;;  %v674_v9 = vld [vmem:[#allocation9 + $0x78] sm:$0xff] (!%p1009_p4)  ;;  %1262 = vmatpush3.bf16.msra.mxu0 (!%p1009_p4), %v1261_v19  ;;  %1281 = vmatpush3.bf16.msra.mxu1 (!%p1009_p4), %v1280_v25 }
 0x481   : > { %v1265_v28 = vpack.c.bf16 %v674_v9, %v673_v23  ;;  %1264 = vmatprep.subr.bf16.mxu0 %v1263_v22  ;;  %1282 = vmatprep.subr.bf16.mxu1 %v1589_v34 }
 0x484   : > { %1266 = vmatpush3.bf16.msra.mxu0 %v1265_v28  ;;  %1284 = vmatpush3.bf16.msra.mxu1 %v1283_v31 }
 0x485   : > { %1285 = vmatprep.subr.bf16.mxu1 %v1589_v34 }
 0x487   : > { %v2046_v63 = vld [vmem:[#allocation3] sm:$0xff] }
 0x488   : > { %v699_v0 = vcombine.high %v2046_v63, %v2046_v63  ;;  %1287 = vmatpush3.bf16.msra.mxu1 %v1286_v37 }
 0x489   : > { %1288 = vmatprep.subr.bf16.mxu1 %v1589_v34  ;;  %v1011_v34 = vld [vmem:[%s2115_s6] ss:$0 sm:$0xff] }
 0x48a   : > { %765 = vmatprep.mubr.f32.mxu0 %v699_v0 }
 0x48b   : > { %766 = vmatmul.mubr.f32.vlgmr.msra.gmra.mrb[0].mxu0 %v2046_v63 }
 0x48c   : > { %1290 = vmatpush3.bf16.msra.mxu1 %v1289_v40 }
 0x55e   : > { %v1052_v44 = vpop.f32.mrb[0].mxu0 }
 0x55f   : > { %v1053_v46 = vpop.f32.mrb[1].mxu0 }
 0x560   : > { %v1054_v49 = vadd.f32 %v1053_v46, %v1052_v44 }
 0x562   : > { %v768_v50 = vadd.f32 %v1054_v49, %v1010_v45 }
 0x564   : > { %v771_v51 = vmax.f32 %v768_v50, 0.0 }
 0x566   : > { %1105 = vmatmul.mubr.f32.vlgmr.msra.gmra.mrb[0].mxu1 %v771_v51 }
 0x639   : > { %v861_v52 = vpop.f32.mrb[0].mxu1 }
 0x63a   : > { %v862_v55 = vadd.f32 %v1011_v34, %v861_v52  ;;  %v1106_v56 = vpop.f32.mrb[1].mxu1 }
 0x63c   : > { %1385 = vtanh.f32 %v862_v55 }
 0x646   : > { %v1386_v57 = vpop.eup %1385 }
 0x647   : > { %v866_v58 = vmul.f32 0.088388346, %v1386_v57 }
 0x649   : > { %867 = vst [vmem:[%s2117_s8] sm:$0xf] %v866_v58 }
 0x64a PF: > { %s1019_s21 = sshll.u32 %s1659_s9, 7  ;;  %s883_s13 = sshll.u32 %s2003_s22, 4  ;;  %s884_s13 = int_to_ptr.vmem [resolvable:$true] %s883_s13 }
 0x64b   : > { %s2071_s11 = scalar_lea.hbm %s2116_s7, %s1019_s21  ;;  %s869_s16 = scalar_lea.sflag [#allocation6], %s1824_s19 }
 0x64c   : > { %s1501_s17 = scalar_lea.vmem %s884_s13, 128  ;;  %s1592_s23 = smov [#allocation12]  }
 0x64d   : > { %p1502_p9 = scmp.ne.s32.totalorder %s884_s13, %s1501_s17  ;;  %s1505_s18 = sshll.u32 %s1592_s23, 4  ;;  %s1506_s18 = int_to_ptr.vmem [resolvable:$false] %s1505_s18 }
 0x64e   : > { %s1507_s14 = scalar_lea.vmem %s1506_s18, 256  ;;  %p1508_p10 = scmp.lt.s32.totalorder %s884_s13, %s1506_s18 }
 0x64f   : > { %p1503_p3 = pnand %p1502_p9, %p1776_p6  ;;  %p1509_p13 = scmp.lt.s32.totalorder %s1507_s14, %s1501_s17 }
 0x651   : > { %p1504_p7 = pneg %p1503_p3  ;;  %p1510_p0 = por %p1509_p13, %p1508_p10 }
 0x653   : > { %p1511_p5 = pnand %p1510_p0, %p1504_p7 }
 0x655   : > { %1514 = shalt.err (!%p1511_p5)
}
 0x656   : > { %s1515_s9 = scalar_lea.hbm %s2071_s11, 128  ;;  %s1519_s26 = scalar_lea.hbm %s2116_s7, 512 }
 0x657   : > { %p1516_p11 = scmp.ne.s32.totalorder %s2071_s11, %s1515_s9  ;;  %p1520_p2 = scmp.lt.u32.totalorder %s2071_s11, %s2116_s7 }
 0x658   : > { %p1521_p1 = scmp.lt.u32.totalorder %s1519_s26, %s1515_s9  ;;  %p1523_p9 = scmp.lt.u32.totalorder %s1515_s9, %s2071_s11 }
 0x659   : > { %p1517_p8 = pnand %p1516_p11, %p1776_p6 }
 0x65a   : > { %p1522_p4 = por %p1521_p1, %p1520_p2 }
 0x65b   : > { %p1518_p12 = pneg %p1517_p8 }
 0x65c   : > { %p1524_p3 = por %p1523_p9, %p1522_p4 }
 0x65e   : > { %p1525_p7 = pnand %p1524_p3, %p1518_p12 }
 0x660   : > { %1528 = shalt.err (!%p1525_p7)
}
 0x661   : > { %1305 = dma.vmem_to_hbm [thread:$0]  (%p1776_p6), %s884_s13, 128, %s2071_s11, %s869_s16  }
 0x662 PF: > { %p1332_p10 = scmp.ge.s32.totalorder %s1575_s30, 2  ;;  %s901_s10 = sand.u32 1, %s1563_s27  }
 0x663   : > { %p2138_p13 = scmp.ne.s32.totalorder %s2123_s12, 0  ;;  %s902_s15 = scalar_lea.sflag [#allocation6], %s901_s10 }
 0x665   : > { %p1322_p0 = pnand %p1332_p10, %p2138_p13 }
 0x667   : > { %1558 = dma.done.wait (!%p1322_p0), %s902_s15, 128  }
 0x668   : > { %1560 = vsyncadd (!%p1322_p0), %s902_s15, 4294967168  ;;  %p24_p5 = scmp.ge.s32.totalorder %s1762_s1, 6   ;;  %s2139_s27 = smov %s1567_s28 }
 0x669   : > { %s2140_s28 = smov %s1571_s29  ;;  %s2141_s29 = smov %s1772_s24 }
 0x66a   : > { %s2142_s30 = smov %s1762_s1  ;;  %26 = sbr.rel (!%p24_p5) target bundleno = 9 (0x9), region = 121 }
 0x671   :  { %907 = vsyncpa [#allocation5], 1 }
 0x672   :  { %909 = vsyncpa [#allocation5 + $0x1], 1 }
 0x673   :  { %910 = vsyncpa [#allocation8], 1 }
 0x674   :  { %911 = vsyncpa [#allocation11], 1 }
 0x675   :  { %912 = vsyncpa [#allocation6], 1 }
 0x676   :  { %914 = vsyncpa [#allocation6 + $0x1], 1 }

// kernel: milnet_forward.3
= control target key start
LH: loop header
LB: loop body
LE: loop exit
PB: predicated region body
PF: predicated region fallthrough
CT: control target
= control target key end

     0   :  { %17 = vsyncpa [#allocation5], 0  ;;  %s2008_s17 = smov 0   ;;  %s2728_s0 = inlined_call_operand.vmem [shape: f32[1024,256], index: 0, kind: input, shape index: {}]   ;;  %s2729_s1 = inlined_call_operand.vmem [shape: f32[256,128], index: 1, kind: input, shape index: {}]   ;;  %s2730_s2 = inlined_call_operand.vmem [shape: f32[1,128], index: 2, kind: input, shape index: {}]   ;;  %s2731_s3 = inlined_call_operand.vmem [shape: f32[128,128], index: 3, kind: input, shape index: {}]   ;;  %s2732_s4 = inlined_call_operand.vmem [shape: f32[1,128], index: 4, kind: input, shape index: {}]   ;;  %s2733_s5 = inlined_call_operand.vmem [shape: f32[4,128], index: 5, kind: input, shape index: {}]   ;;  %s2734_s6 = inlined_call_operand.vmem [shape: f32[4,4,256], index: 6, kind: input, shape index: {}]   ;;  %s2735_s7 = inlined_call_operand.vmem [shape: f32[4,1], index: 7, kind: input, shape index: {}]   ;;  %s2736_s8 = inlined_call_operand.vmem [shape: f32[4,1024], index: 8, kind: output, shape index: {0}]   ;;  %s2737_s9 = inlined_call_operand.hbm [shape: f32[4,256], index: 9, kind: output, shape index: {1}]   ;;  %s2738_s10 = inlined_call_operand.vmem [shape: f32[4,1], index: 10, kind: output, shape index: {2}]   ;;  %s2739_s11 = inlined_call_operand.vmem [shape: f32[4,1], index: 11, kind: output, shape index: {3}]  }
   0x1 LB: > { %s2014_s18 = sadd.s32 4294967295, %s1941_s17   ;;  %p1459_p0 = scmp.ge.s32.totalorder %s1941_s17, 1  ;;  %s1941_s17 = sphi %s2008_s17, %s23_s17  }
   0x2   : > { %p332_p1 = scmp.lt.s32.totalorder %s1941_s17, 5 }
   0x4   : > { %p333_p2 = pnand %p1459_p0, %p332_p1 }
   0x6   : > { %336 = sbr.rel (%p333_p2) target bundleno = 1375 (0x55f), region = 52 }
   0xd   : > { %v450_v0 = vld [vmem:[%s2729_s1] sm:$0xff]  ;;  %v451_v1 = vld [vmem:[%s2729_s1 + $0x8] sm:$0xff]  ;;  %v452_v2 = vld [vmem:[%s2729_s1 + $0x10] sm:$0xff]  ;;  %s1460_s25 = sshll.u32 %s2014_s18, 5  ;;  %v1943_v3 = vmov 0.0|0.0   ;;  %s1463_s28 = sshll.u32 %s2014_s18, 1 }
   0xe   : > { %1639 = vmatprep.subr.bf16.mxu0 %v1943_v3  ;;  %v1640_v4 = vpack.c.bf16 %v451_v1, %v450_v0  ;;  %v453_v5 = vld [vmem:[%s2729_s1 + $0x18] sm:$0xff]  ;;  %p374_p3 = scmp.lt.s32.totalorder %s1460_s25, 127  ;;  %v454_v7 = vld [vmem:[%s2729_s1 + $0x20] sm:$0xff]  ;;  %v455_v8 = vld [vmem:[%s2729_s1 + $0x28] sm:$0xff]  ;;  %p381_p4 = scmp.lt.s32.totalorder %s1463_s28, 7 }
   0xf   : > { %v1643_v6 = vpack.c.bf16 %v453_v5, %v452_v2  ;;  %v1646_v9 = vpack.c.bf16 %v455_v8, %v454_v7  ;;  %v456_v10 = vld [vmem:[%s2729_s1 + $0x30] sm:$0xff]  ;;  %v457_v11 = vld [vmem:[%s2729_s1 + $0x38] sm:$0xff]  ;;  %v458_v14 = vld [vmem:[%s2729_s1 + $0x40] sm:$0xff]  ;;  %p1467_p5 = scmp.ne.s32.totalorder %s2014_s18, 0 }
  0x10   : > { %1641 = vmatpush1.bf16.msra.mxu0 %v1640_v4  ;;  %s2842_s25 = smov (!%p374_p3, %s1460_s25), 127  ;;  %v1649_v13 = vpack.c.bf16 %v457_v11, %v456_v10  ;;  %v459_v15 = vld [vmem:[%s2729_s1 + $0x48] sm:$0xff]  ;;  %v460_v17 = vld [vmem:[%s2729_s1 + $0x50] sm:$0xff]  ;;  %v461_v18 = vld [vmem:[%s2729_s1 + $0x58] sm:$0xff]  ;;  %s2844_s28 = smov (!%p381_p4, %s1463_s28), 7 }
  0x11   : > { %1642 = vmatprep.subr.bf16.mxu0 %v1943_v3  ;;  %s1476_s13 = sshll.u32 %s2842_s25, 4  ;;  %v1652_v16 = vpack.c.bf16 %v459_v15, %v458_v14  ;;  %v1655_v19 = vpack.c.bf16 %v461_v18, %v460_v17  ;;  %v462_v20 = vld [vmem:[%s2729_s1 + $0x60] sm:$0xff]  ;;  %v463_v21 = vld [vmem:[%s2729_s1 + $0x68] sm:$0xff]  ;;  %v464_v23 = vld [vmem:[%s2729_s1 + $0x70] sm:$0xff]  ;;  %s1464_s29 = sshll.u32 %s2844_s28, 2  ;;  %vm1111_vm0 = vcmask (!%p1467_p5), 3072  }
  0x12   : > { %s2042_s16 = scalar_lea.vmem %s2728_s0, %s1476_s13  ;;  %v1658_v22 = vpack.c.bf16 %v463_v21, %v462_v20  ;;  %v465_v24 = vld [vmem:[%s2729_s1 + $0x78] sm:$0xff]  ;;  %v466_v26 = vld [vmem:[%s2729_s1 + $0x80] sm:$0xff]  ;;  %v467_v27 = vld [vmem:[%s2729_s1 + $0x88] sm:$0xff]  ;;  %s384_s13 = scalar_lea.vmem %s2736_s8, %s1464_s29 }
  0x13   : > { %v2052_v12 = vld [vmem:[%s2042_s16 + $0x8] sm:$0xff]  ;;  %v1661_v25 = vpack.c.bf16 %v465_v24, %v464_v23  ;;  %v1664_v28 = vpack.c.bf16 %v467_v27, %v466_v26  ;;  %v468_v29 = vld [vmem:[%s2729_s1 + $0x90] sm:$0xff]  ;;  %v469_v30 = vld [vmem:[%s2729_s1 + $0x98] sm:$0xff] }
  0x14   : > { %1644 = vmatpush1.bf16.msra.mxu0 %v1643_v6  ;;  %553 = vmatprep.mubr.f32.mxu0 %v2052_v12  ;;  %v1667_v31 = vpack.c.bf16 %v469_v30, %v468_v29  ;;  %v470_v32 = vld [vmem:[%s2729_s1 + $0xa0] sm:$0xff]  ;;  %v471_v33 = vld [vmem:[%s2729_s1 + $0xa8] sm:$0xff]  ;;  %v472_v35 = vld [vmem:[%s2729_s1 + $0xb0] sm:$0xff] }
  0x15   : > { %1645 = vmatprep.subr.bf16.mxu0 %v1943_v3  ;;  %v1670_v34 = vpack.c.bf16 %v471_v33, %v470_v32  ;;  %v473_v36 = vld [vmem:[%s2729_s1 + $0xb8] sm:$0xff]  ;;  %v474_v38 = vld [vmem:[%s2729_s1 + $0xc0] sm:$0xff]  ;;  %v475_v39 = vld [vmem:[%s2729_s1 + $0xc8] sm:$0xff] }
  0x16   : > { %v1673_v37 = vpack.c.bf16 %v473_v36, %v472_v35  ;;  %v1676_v40 = vpack.c.bf16 %v475_v39, %v474_v38  ;;  %v476_v41 = vld [vmem:[%s2729_s1 + $0xd0] sm:$0xff]  ;;  %v477_v42 = vld [vmem:[%s2729_s1 + $0xd8] sm:$0xff]  ;;  %v478_v44 = vld [vmem:[%s2729_s1 + $0xe0] sm:$0xff] }
  0x17   : > { %v1679_v43 = vpack.c.bf16 %v477_v42, %v476_v41  ;;  %v479_v45 = vld [vmem:[%s2729_s1 + $0xe8] sm:$0xff]  ;;  %v480_v47 = vld [vmem:[%s2729_s1 + $0xf0] sm:$0xff]  ;;  %v481_v48 = vld [vmem:[%s2729_s1 + $0xf8] sm:$0xff] }
  0x18   : > { %1647 = vmatpush1.bf16.msra.mxu0 %v1646_v9  ;;  %v1682_v46 = vpack.c.bf16 %v479_v45, %v478_v44  ;;  %v1685_v49 = vpack.c.bf16 %v481_v48, %v480_v47  ;;  %v746_v50 = vld [vmem:[%s2731_s3] sm:$0xff]  ;;  %v747_v51 = vld [vmem:[%s2731_s3 + $0x8] sm:$0xff]  ;;  %v748_v52 = vld [vmem:[%s2731_s3 + $0x10] sm:$0xff] }
  0x19   : > { %1648 = vmatprep.subr.bf16.mxu0 %v1943_v3  ;;  %v2150_v53 = vld [vmem:[%s2042_s16] sm:$0xff]  ;;  %v1687_v54 = vpack.c.bf16 %v747_v51, %v746_v50  ;;  %v749_v55 = vld [vmem:[%s2731_s3 + $0x18] sm:$0xff]  ;;  %v751_v59 = vld [vmem:[%s2731_s3 + $0x28] sm:$0xff] }
  0x1a   : > { %v2156_v56 = vld [vmem:[%s2042_s16 + $0x18] sm:$0xff]  ;;  %v1691_v57 = vpack.c.bf16 %v749_v55, %v748_v52  ;;  %v750_v58 = vld [vmem:[%s2731_s3 + $0x20] sm:$0xff]  ;;  %v2167_v60 = vld [vmem:[%s2042_s16 + $0x10] sm:$0xff] }
  0x1b   : > { %1688 = vmatprep.subr.bf16.mxu1 %v1687_v54  ;;  %v1695_v61 = vpack.c.bf16 %v751_v59, %v750_v58  ;;  %v2170_v62 = vld [vmem:[%s2042_s16 + $0x28] sm:$0xff]  ;;  %v752_v63 = vld [vmem:[%s2731_s3 + $0x30] sm:$0xff]  ;;  %v753_v0 = vld [vmem:[%s2731_s3 + $0x38] sm:$0xff] }
  0x1c   : > { %1650 = vmatpush1.bf16.msra.mxu0 %v1649_v13  ;;  %1690 = vmatpush3.bf16.msra.mxu1 %v1687_v54  ;;  %v2181_v1 = vld [vmem:[%s2042_s16 + $0x20] sm:$0xff]  ;;  %v1699_v2 = vpack.c.bf16 %v753_v0, %v752_v63  ;;  %v755_v5 = vld [vmem:[%s2731_s3 + $0x48] sm:$0xff]  ;;  %v2195_v6 = vld [vmem:[%s2042_s16 + $0x30] sm:$0xff] }
  0x1d   : > { %1651 = vmatprep.subr.bf16.mxu0 %v1943_v3  ;;  %1692 = vmatprep.subr.bf16.mxu1 %v1691_v57  ;;  %v754_v4 = vld [vmem:[%s2731_s3 + $0x40] sm:$0xff]  ;;  %v2198_v8 = vld [vmem:[%s2042_s16 + $0x48] sm:$0xff]  ;;  %v756_v9 = vld [vmem:[%s2731_s3 + $0x50] sm:$0xff] }
  0x1e   : > { %v1703_v7 = vpack.c.bf16 %v755_v5, %v754_v4  ;;  %v757_v10 = vld [vmem:[%s2731_s3 + $0x58] sm:$0xff]  ;;  %v2209_v11 = vld [vmem:[%s2042_s16 + $0x40] sm:$0xff]  ;;  %v2217_v15 = vld [vmem:[%s2042_s16 + $0x50] sm:$0xff] }
  0x1f   : > { %v1707_v13 = vpack.c.bf16 %v757_v10, %v756_v9  ;;  %v2212_v14 = vld [vmem:[%s2042_s16 + $0x58] sm:$0xff]  ;;  %v2225_v17 = vld [vmem:[%s2042_s16 + $0x60] sm:$0xff]  ;;  %v2236_v20 = vld [vmem:[%s2042_s16 + $0x88] sm:$0xff] }
  0x20   : > { %1653 = vmatpush1.bf16.msra.mxu0 %v1652_v16  ;;  %1694 = vmatpush3.bf16.msra.mxu1 %v1691_v57  ;;  %v2220_v16 = vld [vmem:[%s2042_s16 + $0x68] sm:$0xff]  ;;  %v2228_v18 = vld [vmem:[%s2042_s16 + $0x78] sm:$0xff]  ;;  %v2241_v21 = vld [vmem:[%s2042_s16 + $0x80] sm:$0xff] }
  0x21   : > { %1654 = vmatprep.subr.bf16.mxu0 %v1943_v3  ;;  %1696 = vmatprep.subr.bf16.mxu1 %v1695_v61  ;;  %v2249_v23 = vld [vmem:[%s2042_s16 + $0x90] sm:$0xff]  ;;  %v2252_v24 = vld [vmem:[%s2042_s16 + $0xa8] sm:$0xff]  ;;  %v2260_v26 = vld [vmem:[%s2042_s16 + $0xb8] sm:$0xff] }
  0x22   : > { %v2265_v27 = vld [vmem:[%s2042_s16 + $0xb0] sm:$0xff]  ;;  %v2273_v29 = vld [vmem:[%s2042_s16 + $0xc0] sm:$0xff]  ;;  %v2276_v30 = vld [vmem:[%s2042_s16 + $0xd8] sm:$0xff] }
  0x23   : > { %v2284_v32 = vld [vmem:[%s2042_s16 + $0xe8] sm:$0xff]  ;;  %v2289_v33 = vld [vmem:[%s2042_s16 + $0xe0] sm:$0xff]  ;;  %v2297_v35 = vld [vmem:[%s2042_s16 + $0xf0] sm:$0xff] }
  0x24   : > { %1656 = vmatpush1.bf16.msra.mxu0 %v1655_v19  ;;  %1698 = vmatpush3.bf16.msra.mxu1 %v1695_v61  ;;  %v2233_v19 = vld [vmem:[%s2042_s16 + $0x70] sm:$0xff]  ;;  %v2300_v36 = vld [vmem:[%s2042_s16 + $0x108] sm:$0xff]  ;;  %v2308_v38 = vld [vmem:[%s2042_s16 + $0x118] sm:$0xff] }
  0x25   : > { %1657 = vmatprep.subr.bf16.mxu0 %v1943_v3  ;;  %1700 = vmatprep.subr.bf16.mxu1 %v1699_v2  ;;  %2772 = vst [vmem:[#allocation8_spill] sm:$0xff] %v2308_v38  ;;  %v2313_v39 = vld [vmem:[%s2042_s16 + $0x110] sm:$0xff]  ;;  %v2321_v41 = vld [vmem:[%s2042_s16 + $0x120] sm:$0xff]  ;;  %v2324_v42 = vld [vmem:[%s2042_s16 + $0x138] sm:$0xff] }
  0x26   : > { %2773 = vst [vmem:[#allocation9_spill] sm:$0xff] %v2313_v39  ;;  %2775 = vst [vmem:[#allocation11_spill] sm:$0xff] %v2321_v41  ;;  %v2332_v44 = vld [vmem:[%s2042_s16 + $0x148] sm:$0xff]  ;;  %v2337_v45 = vld [vmem:[%s2042_s16 + $0x140] sm:$0xff] }
  0x27   : > { %2776 = vst [vmem:[#allocation12_spill] sm:$0xff] %v2324_v42  ;;  %2778 = vst [vmem:[#allocation14_spill] sm:$0xff] %v2332_v44  ;;  %v2345_v47 = vld [vmem:[%s2042_s16 + $0x150] sm:$0xff]  ;;  %v758_v48 = vld [vmem:[%s2731_s3 + $0x60] sm:$0xff] }
  0x28   : > { %1659 = vmatpush1.bf16.msra.mxu0 %v1658_v22  ;;  %1702 = vmatpush3.bf16.msra.mxu1 %v1699_v2  ;;  %v2244_v22 = vld [vmem:[%s2042_s16 + $0x98] sm:$0xff]  ;;  %2779 = vst [vmem:[#allocation15_spill] sm:$0xff] %v2337_v45  ;;  %2781 = vst [vmem:[#allocation17_spill] sm:$0xff] %v2345_v47  ;;  %v2354_v50 = vld [vmem:[%s2042_s16 + $0x168] sm:$0xff] }
  0x29   : > { %1660 = vmatprep.subr.bf16.mxu0 %v1943_v3  ;;  %1704 = vmatprep.subr.bf16.mxu1 %v1703_v7  ;;  %2782 = vst [vmem:[#allocation18_spill] sm:$0xff] %v2354_v50  ;;  %v2359_v52 = vld [vmem:[%s2042_s16 + $0x160] sm:$0xff]  ;;  %v760_v54 = vld [vmem:[%s2731_s3 + $0x70] sm:$0xff]  ;;  %v761_v55 = vld [vmem:[%s2731_s3 + $0x78] sm:$0xff] }
  0x2a   : > { %2783 = vst [vmem:[#allocation19_spill] sm:$0xff] %v2359_v52  ;;  %v2368_v57 = vld [vmem:[%s2042_s16 + $0x178] sm:$0xff]  ;;  %v1715_v58 = vpack.c.bf16 %v761_v55, %v760_v54  ;;  %v2373_v59 = vld [vmem:[%s2042_s16 + $0x170] sm:$0xff]  ;;  %v2376_v61 = vld [vmem:[%s2042_s16 + $0x188] sm:$0xff] }
  0x2b   : > { %2784 = vst [vmem:[#allocation20_spill] sm:$0xff] %v2368_v57  ;;  %2785 = vst [vmem:[#allocation21_spill] sm:$0xff] %v2373_v59  ;;  %v2381_v63 = vld [vmem:[%s2042_s16 + $0x180] sm:$0xff]  ;;  %v2384_v0 = vld [vmem:[%s2042_s16 + $0x198] sm:$0xff] }
  0x2c   : > { %1662 = vmatpush1.bf16.msra.mxu0 %v1661_v25  ;;  %1706 = vmatpush3.bf16.msra.mxu1 %v1703_v7  ;;  %v2257_v25 = vld [vmem:[%s2042_s16 + $0xa0] sm:$0xff]  ;;  %2786 = vst [vmem:[#allocation22_spill] sm:$0xff] %v2376_v61  ;;  %2787 = vst [vmem:[#allocation23_spill] sm:$0xff] %v2381_v63  ;;  %v2389_v2 = vld [vmem:[%s2042_s16 + $0x190] sm:$0xff] }
  0x2d   : > { %1663 = vmatprep.subr.bf16.mxu0 %v1943_v3  ;;  %1708 = vmatprep.subr.bf16.mxu1 %v1707_v13  ;;  %2788 = vst [vmem:[#allocation24_spill] sm:$0xff] %v2384_v0  ;;  %2789 = vst [vmem:[#allocation25_spill] sm:$0xff] %v2389_v2  ;;  %v2392_v4 = vld [vmem:[%s2042_s16 + $0x1a8] sm:$0xff]  ;;  %v2397_v5 = vld [vmem:[%s2042_s16 + $0x1a0] sm:$0xff] }
  0x2e   : > { %2790 = vst [vmem:[#allocation26_spill] sm:$0xff] %v2392_v4  ;;  %2791 = vst [vmem:[#allocation27_spill] sm:$0xff] %v2397_v5  ;;  %v2400_v7 = vld [vmem:[%s2042_s16 + $0x1b8] sm:$0xff]  ;;  %v2405_v9 = vld [vmem:[%s2042_s16 + $0x1b0] sm:$0xff] }
  0x2f   : > { %2792 = vst [vmem:[#allocation28_spill] sm:$0xff] %v2400_v7  ;;  %2793 = vst [vmem:[#allocation29_spill] sm:$0xff] %v2405_v9  ;;  %v2408_v10 = vld [vmem:[%s2042_s16 + $0x1c8] sm:$0xff]  ;;  %v2429_v54 = vld [vmem:[%s2042_s16 + $0x1e0] sm:$0xff] }
  0x30   : > { %1665 = vmatpush1.bf16.msra.mxu0 %v1664_v28  ;;  %1710 = vmatpush3.bf16.msra.mxu1 %v1707_v13  ;;  %v2268_v28 = vld [vmem:[%s2042_s16 + $0xc8] sm:$0xff]  ;;  %2794 = vst [vmem:[#allocation30_spill] sm:$0xff] %v2408_v10  ;;  %v2413_v13 = vld [vmem:[%s2042_s16 + $0x1c0] sm:$0xff]  ;;  %2799 = vst [vmem:[#allocation35_spill] sm:$0xff] %v2429_v54 }
  0x31   : > { %1666 = vmatprep.subr.bf16.mxu0 %v1943_v3  ;;  %2795 = vst [vmem:[#allocation31_spill] sm:$0xff] %v2413_v13  ;;  %v2432_v55 = vld [vmem:[%s2042_s16 + $0x1f8] sm:$0xff] }
  0x32   : > { %2800 = vst [vmem:[#allocation36_spill] sm:$0xff] %v2432_v55 }
  0x34   : > { %1668 = vmatpush1.bf16.msra.mxu0 %v1667_v31  ;;  %v2281_v31 = vld [vmem:[%s2042_s16 + $0xd0] sm:$0xff] }
  0x35   : > { %1669 = vmatprep.subr.bf16.mxu0 %v1943_v3 }
  0x38   : > { %1671 = vmatpush1.bf16.msra.mxu0 %v1670_v34  ;;  %v2292_v34 = vld [vmem:[%s2042_s16 + $0xf8] sm:$0xff] }
  0x39   : > { %1672 = vmatprep.subr.bf16.mxu0 %v1943_v3 }
  0x3c   : > { %1674 = vmatpush1.bf16.msra.mxu0 %v1673_v37  ;;  %v2305_v37 = vld [vmem:[%s2042_s16 + $0x100] sm:$0xff] }
  0x3d   : > { %1675 = vmatprep.subr.bf16.mxu0 %v1943_v3  ;;  %2771 = vst [vmem:[#allocation7_spill] sm:$0xff] %v2305_v37 }
  0x40   : > { %1677 = vmatpush1.bf16.msra.mxu0 %v1676_v40  ;;  %v2316_v40 = vld [vmem:[%s2042_s16 + $0x128] sm:$0xff] }
  0x41   : > { %1678 = vmatprep.subr.bf16.mxu0 %v1943_v3  ;;  %2774 = vst [vmem:[#allocation10_spill] sm:$0xff] %v2316_v40 }
  0x44   : > { %1680 = vmatpush1.bf16.msra.mxu0 %v1679_v43  ;;  %v2329_v43 = vld [vmem:[%s2042_s16 + $0x130] sm:$0xff] }
  0x45   : > { %1681 = vmatprep.subr.bf16.mxu0 %v1943_v3  ;;  %2777 = vst [vmem:[#allocation13_spill] sm:$0xff] %v2329_v43 }
  0x48   : > { %1683 = vmatpush1.bf16.msra.mxu0 %v1682_v46  ;;  %v2340_v46 = vld [vmem:[%s2042_s16 + $0x158] sm:$0xff] }
  0x49   : > { %1684 = vmatprep.subr.bf16.mxu0 %v1943_v3  ;;  %v2184_v3 = vld [vmem:[%s2042_s16 + $0x38] sm:$0xff]  ;;  %2780 = vst [vmem:[#allocation16_spill] sm:$0xff] %v2340_v46 }
  0x4c   : > { %1686 = vmatpush1.bf16.msra.mxu0 %v1685_v49  ;;  %v759_v49 = vld [vmem:[%s2731_s3 + $0x68] sm:$0xff] }
  0x4d   : > { %v1711_v51 = vpack.c.bf16 %v759_v49, %v758_v48  ;;  %v2416_v48 = vld [vmem:[%s2042_s16 + $0x1d8] sm:$0xff]  ;;  %v2421_v49 = vld [vmem:[%s2042_s16 + $0x1d0] sm:$0xff] }
  0x4e   : > { %2796 = vst [vmem:[#allocation32_spill] sm:$0xff] %v2416_v48  ;;  %2797 = vst [vmem:[#allocation33_spill] sm:$0xff] %v2421_v49 }
  0x4f   : > { %554 = vmatmul.mubr.f32.vlgmr.msra.gmra.mrb[0].mxu0 %v2150_v53  ;;  %1712 = vmatprep.subr.bf16.mxu1 %v1711_v51 }
  0x50   : > { %558 = vmatprep.mubr.f32.mxu0 %v2156_v56  ;;  %1714 = vmatpush3.bf16.msra.mxu1 %v1711_v51  ;;  %v2424_v51 = vld [vmem:[%s2042_s16 + $0x1e8] sm:$0xff] }
  0x51   : > { %1716 = vmatprep.subr.bf16.mxu1 %v1715_v58  ;;  %2798 = vst [vmem:[#allocation34_spill] sm:$0xff] %v2424_v51 }
  0x53   : > { %559 = vmatmul.mubr.f32.gmra.mrb[2].mxu0 %v2167_v60 }
  0x54   : > { %563 = vmatprep.mubr.f32.mxu0 %v2170_v62  ;;  %1718 = vmatpush3.bf16.msra.mxu1 %v1715_v58  ;;  %v2437_v58 = vld [vmem:[%s2042_s16 + $0x1f0] sm:$0xff] }
  0x55   : > { %2801 = vst [vmem:[#allocation37_spill] sm:$0xff] %v2437_v58 }
  0x57   : > { %564 = vmatmul.mubr.f32.gmra.mrb[4].mxu0 %v2181_v1 }
  0x58   : > { %568 = vmatprep.mubr.f32.mxu0 %v2184_v3 }
  0x5b   : > { %569 = vmatmul.mubr.f32.gmra.mrb[6].mxu0 %v2195_v6 }
  0x5c   : > { %573 = vmatprep.mubr.f32.mxu0 %v2198_v8 }
  0x5f   : > { %574 = vmatmul.mubr.f32.gmra.mrb[8].mxu0 %v2209_v11 }
  0x60   : > { %578 = vmatprep.mubr.f32.mxu0 %v2212_v14 }
  0x63   : > { %579 = vmatmul.mubr.f32.gmra.mrb[10].mxu0 %v2217_v15 }
  0x64   : > { %583 = vmatprep.mubr.f32.mxu0 %v2220_v16 }
  0x67   : > { %584 = vmatmul.mubr.f32.gmra.mrb[12].mxu0 %v2225_v17 }
  0x68   : > { %588 = vmatprep.mubr.f32.mxu0 %v2228_v18 }
  0x6b   : > { %589 = vmatmul.mubr.f32.gmra.mrb[14].mxu0 %v2233_v19 }
  0x6c   : > { %593 = vmatprep.mubr.f32.mxu0 %v2236_v20 }
  0x6f   : > { %594 = vmatmul.mubr.f32.gmra.mrb[16].mxu0 %v2241_v21 }
  0x70   : > { %598 = vmatprep.mubr.f32.mxu0 %v2244_v22 }
  0x73   : > { %599 = vmatmul.mubr.f32.gmra.mrb[18].mxu0 %v2249_v23 }
  0x74   : > { %603 = vmatprep.mubr.f32.mxu0 %v2252_v24 }
  0x77   : > { %604 = vmatmul.mubr.f32.gmra.mrb[20].mxu0 %v2257_v25 }
  0x78   : > { %608 = vmatprep.mubr.f32.mxu0 %v2260_v26 }
  0x7b   : > { %609 = vmatmul.mubr.f32.gmra.mrb[22].mxu0 %v2265_v27 }
  0x7c   : > { %613 = vmatprep.mubr.f32.mxu0 %v2268_v28 }
  0x7f   : > { %614 = vmatmul.mubr.f32.gmra.mrb[24].mxu0 %v2273_v29 }
  0x80   : > { %618 = vmatprep.mubr.f32.mxu0 %v2276_v30 }
  0x83   : > { %619 = vmatmul.mubr.f32.gmra.mrb[26].mxu0 %v2281_v31 }
  0x84   : > { %623 = vmatprep.mubr.f32.mxu0 %v2284_v32 }
  0x87   : > { %624 = vmatmul.mubr.f32.gmra.mrb[28].mxu0 %v2289_v33 }
  0x88   : > { %628 = vmatprep.mubr.f32.mxu0 %v2292_v34 }
  0x8b   : > { %629 = vmatmul.mubr.f32.gmra.mrb[30].mxu0 %v2297_v35 }
  0x8c   : > { %633 = vmatprep.mubr.f32.mxu0 %v2300_v36 }
  0x8f   : > { %634 = vmatmul.mubr.f32.gmra.mrb[32].mxu0 %v2305_v37 }
  0x90   : > { %638 = vmatprep.mubr.f32.mxu0 %v2308_v38 }
  0x93   : > { %639 = vmatmul.mubr.f32.gmra.mrb[34].mxu0 %v2313_v39 }
  0x94   : > { %643 = vmatprep.mubr.f32.mxu0 %v2316_v40 }
  0x97   : > { %644 = vmatmul.mubr.f32.gmra.mrb[36].mxu0 %v2321_v41 }
  0x98   : > { %648 = vmatprep.mubr.f32.mxu0 %v2324_v42 }
  0x9b   : > { %649 = vmatmul.mubr.f32.gmra.mrb[38].mxu0 %v2329_v43 }
  0x9c   : > { %653 = vmatprep.mubr.f32.mxu0 %v2332_v44 }
  0x9f   : > { %654 = vmatmul.mubr.f32.gmra.mrb[40].mxu0 %v2337_v45 }
  0xa0   : > { %658 = vmatprep.mubr.f32.mxu0 %v2340_v46 }
  0xa3   : > { %659 = vmatmul.mubr.f32.gmra.mrb[42].mxu0 %v2345_v47 }
  0xa4   : > { %663 = vmatprep.mubr.f32.mxu0 %v2354_v50 }
  0xa7   : > { %664 = vmatmul.mubr.f32.gmra.mrb[44].mxu0 %v2359_v52 }
  0xa8   : > { %668 = vmatprep.mubr.f32.mxu0 %v2368_v57 }
  0xab   : > { %669 = vmatmul.mubr.f32.gmra.mrb[46].mxu0 %v2373_v59 }
  0xac   : > { %673 = vmatprep.mubr.f32.mxu0 %v2376_v61 }
  0xaf   : > { %674 = vmatmul.mubr.f32.gmra.mrb[48].mxu0 %v2381_v63 }
  0xb0   : > { %678 = vmatprep.mubr.f32.mxu0 %v2384_v0 }
  0xb3   : > { %679 = vmatmul.mubr.f32.gmra.mrb[50].mxu0 %v2389_v2 }
  0xb4   : > { %683 = vmatprep.mubr.f32.mxu0 %v2392_v4 }
  0xb7   : > { %684 = vmatmul.mubr.f32.gmra.mrb[52].mxu0 %v2397_v5 }
  0xb8   : > { %688 = vmatprep.mubr.f32.mxu0 %v2400_v7 }
  0xbb   : > { %689 = vmatmul.mubr.f32.gmra.mrb[54].mxu0 %v2405_v9 }
  0xbc   : > { %693 = vmatprep.mubr.f32.mxu0 %v2408_v10 }
  0xbf   : > { %694 = vmatmul.mubr.f32.gmra.mrb[56].mxu0 %v2413_v13  ;;  %v2443_v13 = vld [vmem:[%s2730_s2] ss:$0 sm:$0xff] }
  0xc0   : > { %698 = vmatprep.mubr.f32.mxu0 %v2416_v48 }
  0xc3   : > { %699 = vmatmul.mubr.f32.gmra.mrb[58].mxu0 %v2421_v49 }
  0xc4   : > { %703 = vmatprep.mubr.f32.mxu0 %v2424_v51 }
  0xc7   : > { %704 = vmatmul.mubr.f32.gmra.mrb[60].mxu0 %v2429_v54 }
  0xc8   : > { %708 = vmatprep.mubr.f32.mxu0 %v2432_v55 }
  0xcb   : > { %709 = vmatmul.mubr.f32.gmra.mrb[62].mxu0 %v2437_v58 }
 0x122   : > { %v555_v49 = vpop.f32.mrb[0].mxu0 }
 0x123   : > { %v557_v48 = vpop.f32.mrb[1].mxu0  ;;  %v556_v51 = vadd.f32 %v2443_v13, %v555_v49 }
 0x125   : > { %v714_v10 = vmax.f32 %v556_v51, 0.0 }
 0x126   : > { %v560_v9 = vpop.f32.mrb[2].mxu0 }
 0x127   : > { %v561_v5 = vadd.f32 %v2443_v13, %v560_v9  ;;  %v562_v54 = vpop.f32.mrb[3].mxu0  ;;  %1591 = vmatprep.mubr.f32.mxu1 %v714_v10 }
 0x129   : > { %v715_v55 = vmax.f32 %v561_v5, 0.0 }
 0x12a   : > { %v565_v7 = vpop.f32.mrb[4].mxu0 }
 0x12b   : > { %v566_v4 = vadd.f32 %v2443_v13, %v565_v7  ;;  %v567_v58 = vpop.f32.mrb[5].mxu0  ;;  %1592 = vmatmul.mubr.f32.vlgmr.msra.gmra.mrb[0].mxu1 %v715_v55 }
 0x12d   : > { %v716_v2 = vmax.f32 %v566_v4, 0.0 }
 0x12e   : > { %v570_v63 = vpop.f32.mrb[6].mxu0 }
 0x12f   : > { %v571_v0 = vadd.f32 %v2443_v13, %v570_v63  ;;  %v572_v61 = vpop.f32.mrb[7].mxu0  ;;  %1594 = vmatprep.mubr.f32.mxu1 %v716_v2 }
 0x131   : > { %v717_v48 = vmax.f32 %v571_v0, 0.0 }
 0x132   : > { %v575_v49 = vpop.f32.mrb[8].mxu0 }
 0x133   : > { %v576_v51 = vadd.f32 %v2443_v13, %v575_v49  ;;  %v577_v59 = vpop.f32.mrb[9].mxu0  ;;  %1595 = vmatmul.mubr.f32.gmra.mrb[2].mxu1 %v717_v48 }
 0x135   : > { %v718_v9 = vmax.f32 %v576_v51, 0.0 }
 0x136   : > { %v580_v10 = vpop.f32.mrb[10].mxu0 }
 0x137   : > { %v581_v5 = vadd.f32 %v2443_v13, %v580_v10  ;;  %v582_v54 = vpop.f32.mrb[11].mxu0  ;;  %1597 = vmatprep.mubr.f32.mxu1 %v718_v9 }
 0x139   : > { %v719_v7 = vmax.f32 %v581_v5, 0.0 }
 0x13a   : > { %v585_v55 = vpop.f32.mrb[12].mxu0 }
 0x13b   : > { %v586_v4 = vadd.f32 %v2443_v13, %v585_v55  ;;  %v587_v58 = vpop.f32.mrb[13].mxu0  ;;  %1598 = vmatmul.mubr.f32.gmra.mrb[4].mxu1 %v719_v7 }
 0x13d   : > { %v720_v61 = vmax.f32 %v586_v4, 0.0 }
 0x13e   : > { %v590_v63 = vpop.f32.mrb[14].mxu0 }
 0x13f   : > { %v591_v0 = vadd.f32 %v2443_v13, %v590_v63  ;;  %v592_v2 = vpop.f32.mrb[15].mxu0  ;;  %1600 = vmatprep.mubr.f32.mxu1 %v720_v61 }
 0x141   : > { %v721_v59 = vmax.f32 %v591_v0, 0.0 }
 0x142   : > { %v595_v48 = vpop.f32.mrb[16].mxu0 }
 0x143   : > { %v596_v49 = vadd.f32 %v2443_v13, %v595_v48  ;;  %v597_v51 = vpop.f32.mrb[17].mxu0  ;;  %1601 = vmatmul.mubr.f32.gmra.mrb[6].mxu1 %v721_v59 }
 0x145   : > { %v722_v10 = vmax.f32 %v596_v49, 0.0 }
 0x146   : > { %v600_v9 = vpop.f32.mrb[18].mxu0 }
 0x147   : > { %v601_v5 = vadd.f32 %v2443_v13, %v600_v9  ;;  %v602_v54 = vpop.f32.mrb[19].mxu0  ;;  %1603 = vmatprep.mubr.f32.mxu1 %v722_v10 }
 0x149   : > { %v723_v55 = vmax.f32 %v601_v5, 0.0 }
 0x14a   : > { %v605_v7 = vpop.f32.mrb[20].mxu0 }
 0x14b   : > { %v606_v4 = vadd.f32 %v2443_v13, %v605_v7  ;;  %v607_v58 = vpop.f32.mrb[21].mxu0  ;;  %1604 = vmatmul.mubr.f32.gmra.mrb[8].mxu1 %v723_v55 }
 0x14d   : > { %v724_v63 = vmax.f32 %v606_v4, 0.0 }
 0x14e   : > { %v610_v61 = vpop.f32.mrb[22].mxu0 }
 0x14f   : > { %v611_v0 = vadd.f32 %v2443_v13, %v610_v61  ;;  %v612_v2 = vpop.f32.mrb[23].mxu0  ;;  %1606 = vmatprep.mubr.f32.mxu1 %v724_v63 }
 0x151   : > { %v725_v48 = vmax.f32 %v611_v0, 0.0 }
 0x152   : > { %v615_v59 = vpop.f32.mrb[24].mxu0 }
 0x153   : > { %v616_v49 = vadd.f32 %v2443_v13, %v615_v59  ;;  %v617_v51 = vpop.f32.mrb[25].mxu0  ;;  %1607 = vmatmul.mubr.f32.gmra.mrb[10].mxu1 %v725_v48 }
 0x155   : > { %v726_v9 = vmax.f32 %v616_v49, 0.0 }
 0x156   : > { %v620_v10 = vpop.f32.mrb[26].mxu0 }
 0x157   : > { %v621_v5 = vadd.f32 %v2443_v13, %v620_v10  ;;  %v622_v54 = vpop.f32.mrb[27].mxu0  ;;  %1609 = vmatprep.mubr.f32.mxu1 %v726_v9 }
 0x159   : > { %v727_v7 = vmax.f32 %v621_v5, 0.0 }
 0x15a   : > { %v625_v55 = vpop.f32.mrb[28].mxu0 }
 0x15b   : > { %v626_v4 = vadd.f32 %v2443_v13, %v625_v55  ;;  %v627_v58 = vpop.f32.mrb[29].mxu0  ;;  %1610 = vmatmul.mubr.f32.gmra.mrb[12].mxu1 %v727_v7 }
 0x15d   : > { %v728_v61 = vmax.f32 %v626_v4, 0.0 }
 0x15e   : > { %v630_v63 = vpop.f32.mrb[30].mxu0 }
 0x15f   : > { %v631_v0 = vadd.f32 %v2443_v13, %v630_v63  ;;  %v632_v2 = vpop.f32.mrb[31].mxu0  ;;  %1612 = vmatprep.mubr.f32.mxu1 %v728_v61 }
 0x161   : > { %v729_v59 = vmax.f32 %v631_v0, 0.0 }
 0x162   : > { %v635_v48 = vpop.f32.mrb[32].mxu0 }
 0x163   : > { %v636_v49 = vadd.f32 %v2443_v13, %v635_v48  ;;  %v637_v51 = vpop.f32.mrb[33].mxu0  ;;  %1613 = vmatmul.mubr.f32.gmra.mrb[14].mxu1 %v729_v59 }
 0x165   : > { %v730_v10 = vmax.f32 %v636_v49, 0.0 }
 0x166   : > { %v640_v9 = vpop.f32.mrb[34].mxu0 }
 0x167   : > { %v641_v5 = vadd.f32 %v2443_v13, %v640_v9  ;;  %v642_v54 = vpop.f32.mrb[35].mxu0  ;;  %1615 = vmatprep.mubr.f32.mxu1 %v730_v10 }
 0x169   : > { %v731_v55 = vmax.f32 %v641_v5, 0.0 }
 0x16a   : > { %v645_v7 = vpop.f32.mrb[36].mxu0 }
 0x16b   : > { %v646_v4 = vadd.f32 %v2443_v13, %v645_v7  ;;  %v647_v58 = vpop.f32.mrb[37].mxu0  ;;  %1616 = vmatmul.mubr.f32.gmra.mrb[16].mxu1 %v731_v55 }
 0x16d   : > { %v732_v63 = vmax.f32 %v646_v4, 0.0 }
 0x16e   : > { %v650_v61 = vpop.f32.mrb[38].mxu0 }
 0x16f   : > { %v651_v0 = vadd.f32 %v2443_v13, %v650_v61  ;;  %v652_v2 = vpop.f32.mrb[39].mxu0  ;;  %1618 = vmatprep.mubr.f32.mxu1 %v732_v63 }
 0x171   : > { %v733_v48 = vmax.f32 %v651_v0, 0.0 }
 0x172   : > { %v655_v59 = vpop.f32.mrb[40].mxu0 }
 0x173   : > { %v656_v49 = vadd.f32 %v2443_v13, %v655_v59  ;;  %v657_v51 = vpop.f32.mrb[41].mxu0  ;;  %1619 = vmatmul.mubr.f32.gmra.mrb[18].mxu1 %v733_v48 }
 0x175   : > { %v734_v9 = vmax.f32 %v656_v49, 0.0 }
 0x176   : > { %v660_v10 = vpop.f32.mrb[42].mxu0 }
 0x177   : > { %v661_v5 = vadd.f32 %v2443_v13, %v660_v10  ;;  %v662_v54 = vpop.f32.mrb[43].mxu0  ;;  %1621 = vmatprep.mubr.f32.mxu1 %v734_v9 }
 0x179   : > { %v735_v7 = vmax.f32 %v661_v5, 0.0 }
 0x17a   : > { %v665_v55 = vpop.f32.mrb[44].mxu0 }
 0x17b   : > { %v666_v4 = vadd.f32 %v2443_v13, %v665_v55  ;;  %v667_v58 = vpop.f32.mrb[45].mxu0  ;;  %1622 = vmatmul.mubr.f32.gmra.mrb[20].mxu1 %v735_v7 }
 0x17d   : > { %v736_v61 = vmax.f32 %v666_v4, 0.0 }
 0x17e   : > { %v670_v63 = vpop.f32.mrb[46].mxu0 }
 0x17f   : > { %v671_v0 = vadd.f32 %v2443_v13, %v670_v63  ;;  %v672_v2 = vpop.f32.mrb[47].mxu0  ;;  %1624 = vmatprep.mubr.f32.mxu1 %v736_v61 }
 0x181   : > { %v737_v59 = vmax.f32 %v671_v0, 0.0 }
 0x182   : > { %v675_v48 = vpop.f32.mrb[48].mxu0 }
 0x183   : > { %v676_v49 = vadd.f32 %v2443_v13, %v675_v48  ;;  %v677_v51 = vpop.f32.mrb[49].mxu0  ;;  %1625 = vmatmul.mubr.f32.gmra.mrb[22].mxu1 %v737_v59 }
 0x185   : > { %v738_v10 = vmax.f32 %v676_v49, 0.0 }
 0x186   : > { %v680_v9 = vpop.f32.mrb[50].mxu0 }
 0x187   : > { %v681_v5 = vadd.f32 %v2443_v13, %v680_v9  ;;  %v682_v54 = vpop.f32.mrb[51].mxu0  ;;  %1627 = vmatprep.mubr.f32.mxu1 %v738_v10 }
 0x189   : > { %v739_v55 = vmax.f32 %v681_v5, 0.0 }
 0x18a   : > { %v685_v7 = vpop.f32.mrb[52].mxu0 }
 0x18b   : > { %v686_v4 = vadd.f32 %v2443_v13, %v685_v7  ;;  %v687_v58 = vpop.f32.mrb[53].mxu0  ;;  %1628 = vmatmul.mubr.f32.gmra.mrb[24].mxu1 %v739_v55 }
 0x18d   : > { %v740_v63 = vmax.f32 %v686_v4, 0.0 }
 0x18e   : > { %v690_v61 = vpop.f32.mrb[54].mxu0 }
 0x18f   : > { %v691_v0 = vadd.f32 %v2443_v13, %v690_v61  ;;  %v692_v2 = vpop.f32.mrb[55].mxu0  ;;  %1630 = vmatprep.mubr.f32.mxu1 %v740_v63 }
 0x191   : > { %v741_v48 = vmax.f32 %v691_v0, 0.0 }
 0x192   : > { %v695_v59 = vpop.f32.mrb[56].mxu0 }
 0x193   : > { %v696_v49 = vadd.f32 %v2443_v13, %v695_v59  ;;  %v697_v51 = vpop.f32.mrb[57].mxu0  ;;  %1631 = vmatmul.mubr.f32.gmra.mrb[26].mxu1 %v741_v48  ;;  %v2480_v48 = vld [vmem:[%s2732_s4] ss:$0 sm:$0xff] }
 0x195   : > { %v742_v9 = vmax.f32 %v696_v49, 0.0 }
 0x196   : > { %v700_v10 = vpop.f32.mrb[58].mxu0 }
 0x197   : > { %v701_v5 = vadd.f32 %v2443_v13, %v700_v10  ;;  %v702_v54 = vpop.f32.mrb[59].mxu0  ;;  %1633 = vmatprep.mubr.f32.mxu1 %v742_v9 }
 0x199   : > { %v743_v7 = vmax.f32 %v701_v5, 0.0 }
 0x19a   : > { %v705_v55 = vpop.f32.mrb[60].mxu0 }
 0x19b   : > { %v706_v4 = vadd.f32 %v2443_v13, %v705_v55  ;;  %v707_v58 = vpop.f32.mrb[61].mxu0  ;;  %1634 = vmatmul.mubr.f32.gmra.mrb[28].mxu1 %v743_v7  ;;  %v2489_v55 = vld [vmem:[%s2733_s5] sm:$0xf] }
 0x19d   : > { %v744_v61 = vmax.f32 %v706_v4, 0.0 }
 0x19e   : > { %v710_v63 = vpop.f32.mrb[62].mxu0 }
 0x19f   : > { %v711_v0 = vadd.f32 %v2443_v13, %v710_v63  ;;  %v712_v2 = vpop.f32.mrb[63].mxu0  ;;  %1636 = vmatprep.mubr.f32.mxu1 %v744_v61 }
 0x1a1   : > { %v745_v59 = vmax.f32 %v711_v0, 0.0 }
 0x1a3   : > { %1637 = vmatmul.mubr.f32.gmra.mrb[30].mxu1 %v745_v59 }
 0x1a4   : > { %1557 = vmatprep.mubr.f32.mxu1 %v2489_v55 }
 0x1fe   : > { %v1593_v49 = vpop.f32.mrb[0].mxu1 }
 0x1ff   : > { %v841_v51 = vadd.f32 %v1593_v49, %v2480_v48  ;;  %v835_v9 = vpop.f32.mrb[1].mxu1 }
 0x200   : > { %v836_v10 = vadd.f32 %v2480_v48, %v835_v9 }
 0x201   : > { %1834 = vtanh.f32 %v841_v51 }
 0x202   : > { %1836 = vtanh.f32 %v836_v10 }
 0x206   : > { %v1596_v5 = vpop.f32.mrb[2].mxu1 }
 0x207   : > { %v851_v13 = vadd.f32 %v1596_v5, %v2480_v48  ;;  %v845_v54 = vpop.f32.mrb[3].mxu1 }
 0x208   : > { %v846_v7 = vadd.f32 %v2480_v48, %v845_v54 }
 0x209   : > { %1838 = vtanh.f32 %v851_v13 }
 0x20a   : > { %1840 = vtanh.f32 %v846_v7 }
 0x20b   : > { %v2492_v4 = vpop.eup %1834 }
 0x20c   : > { %v2494_v58 = vpop.eup %1836 }
 0x20e   : > { %v1599_v63 = vpop.f32.mrb[4].mxu1 }
 0x20f   : > { %v861_v0 = vadd.f32 %v1599_v63, %v2480_v48  ;;  %v855_v2 = vpop.f32.mrb[5].mxu1 }
 0x210   : > { %v856_v59 = vadd.f32 %v2480_v48, %v855_v2 }
 0x211   : > { %1842 = vtanh.f32 %v861_v0 }
 0x212   : > { %1844 = vtanh.f32 %v856_v59 }
 0x213   : > { %v2500_v49 = vpop.eup %1838 }
 0x214   : > { %v2502_v51 = vpop.eup %1840 }
 0x216   : > { %v1602_v10 = vpop.f32.mrb[6].mxu1 }
 0x217   : > { %v871_v5 = vadd.f32 %v1602_v10, %v2480_v48  ;;  %v865_v13 = vpop.f32.mrb[7].mxu1 }
 0x218   : > { %v866_v54 = vadd.f32 %v2480_v48, %v865_v13 }
 0x219   : > { %1846 = vtanh.f32 %v871_v5 }
 0x21a   : > { %1848 = vtanh.f32 %v866_v54 }
 0x21b   : > { %v2508_v7 = vpop.eup %1842 }
 0x21c   : > { %v2510_v63 = vpop.eup %1844 }
 0x21e   : > { %v1605_v2 = vpop.f32.mrb[8].mxu1 }
 0x21f   : > { %v881_v59 = vadd.f32 %v1605_v2, %v2480_v48  ;;  %v875_v61 = vpop.f32.mrb[9].mxu1 }
 0x220   : > { %v876_v9 = vadd.f32 %v2480_v48, %v875_v61 }
 0x221   : > { %1850 = vtanh.f32 %v881_v59 }
 0x222   : > { %1852 = vtanh.f32 %v876_v9 }
 0x223   : > { %v2516_v10 = vpop.eup %1846 }
 0x224   : > { %v2518_v13 = vpop.eup %1848 }
 0x226   : > { %v1608_v54 = vpop.f32.mrb[10].mxu1 }
 0x227   : > { %v891_v52 = vadd.f32 %v1608_v54, %v2480_v48  ;;  %v885_v57 = vpop.f32.mrb[11].mxu1 }
 0x228   : > { %v886_v0 = vadd.f32 %v2480_v48, %v885_v57 }
 0x229   : > { %1854 = vtanh.f32 %v891_v52 }
 0x22a   : > { %1856 = vtanh.f32 %v886_v0 }
 0x22b   : > { %v2524_v2 = vpop.eup %1850 }
 0x22c   : > { %v2526_v61 = vpop.eup %1852 }
 0x22e   : > { %v1611_v59 = vpop.f32.mrb[12].mxu1 }
 0x22f   : > { %v901_v50 = vadd.f32 %v1611_v59, %v2480_v48  ;;  %v895_v47 = vpop.f32.mrb[13].mxu1 }
 0x230   : > { %v896_v5 = vadd.f32 %v2480_v48, %v895_v47 }
 0x231   : > { %1858 = vtanh.f32 %v901_v50 }
 0x232   : > { %1860 = vtanh.f32 %v896_v5 }
 0x233   : > { %v2532_v54 = vpop.eup %1854 }
 0x234   : > { %v2534_v57 = vpop.eup %1856 }
 0x236   : > { %v1614_v0 = vpop.f32.mrb[14].mxu1 }
 0x237   : > { %v911_v45 = vadd.f32 %v1614_v0, %v2480_v48  ;;  %v905_v46 = vpop.f32.mrb[15].mxu1 }
 0x238   : > { %v906_v9 = vadd.f32 %v2480_v48, %v905_v46 }
 0x239   : > { %1862 = vtanh.f32 %v911_v45  ;;  %v2802_v45 = vpack.c.bf16 %v2492_v4, %v2494_v58 }
 0x23a   : > { %1864 = vtanh.f32 %v906_v9 }
 0x23b   : > { %v2540_v59 = vpop.eup %1858 }
 0x23c   : > { %v2542_v47 = vpop.eup %1860 }
 0x23e   : > { %v1617_v5 = vpop.f32.mrb[16].mxu1 }
 0x23f   : > { %v921_v44 = vadd.f32 %v1617_v5, %v2480_v48  ;;  %v915_v43 = vpop.f32.mrb[17].mxu1 }
 0x240   : > { %v916_v52 = vadd.f32 %v2480_v48, %v915_v43 }
 0x241   : > { %1866 = vtanh.f32 %v921_v44 }
 0x242   : > { %1868 = vtanh.f32 %v916_v52 }
 0x243   : > { %v2548_v0 = vpop.eup %1862 }
 0x244   : > { %v2550_v46 = vpop.eup %1864 }
 0x246   : > { %v1620_v9 = vpop.f32.mrb[18].mxu1 }
 0x247   : > { %v931_v41 = vadd.f32 %v1620_v9, %v2480_v48  ;;  %v925_v42 = vpop.f32.mrb[19].mxu1 }
 0x248   : > { %v926_v50 = vadd.f32 %v2480_v48, %v925_v42 }
 0x249   : > { %1870 = vtanh.f32 %v931_v41 }
 0x24a   : > { %1872 = vtanh.f32 %v926_v50 }
 0x24b   : > { %v1867_v5 = vpop.eup %1866 }
 0x24c   : > { %v1869_v40 = vpop.eup %1868 }
 0x24d   : > { %v1719_v43 = vpack.c.bf16 %v1867_v5, %v1869_v40 }
 0x24e   : > { %v1623_v44 = vpop.f32.mrb[20].mxu1 }
 0x24f   : > { %v941_v52 = vadd.f32 %v1623_v44, %v2480_v48  ;;  %v935_v39 = vpop.f32.mrb[21].mxu1  ;;  %1720 = vmatprep.subr.bf16.mxu1 %v1719_v43  ;;  %v2803_v43 = vpack.c.bf16 %v2500_v49, %v2502_v51 }
 0x250   : > { %v936_v37 = vadd.f32 %v2480_v48, %v935_v39  ;;  %1722 = vmatpush3.bf16.xpose.msra.mxu1 %v2802_v45 }
 0x251   : > { %1874 = vtanh.f32 %v941_v52 }
 0x252   : > { %1876 = vtanh.f32 %v936_v37 }
 0x253   : > { %v1871_v9 = vpop.eup %1870 }
 0x254   : > { %v1873_v42 = vpop.eup %1872 }
 0x255   : > { %v1723_v41 = vpack.c.bf16 %v1871_v9, %v1873_v42  ;;  %v2804_v9 = vpack.c.bf16 %v2508_v7, %v2510_v63 }
 0x256   : > { %v1626_v50 = vpop.f32.mrb[22].mxu1 }
 0x257   : > { %v951_v38 = vadd.f32 %v1626_v50, %v2480_v48  ;;  %v945_v40 = vpop.f32.mrb[23].mxu1  ;;  %1724 = vmatprep.subr.bf16.mxu1 %v1723_v41 }
 0x258   : > { %v946_v5 = vadd.f32 %v2480_v48, %v945_v40  ;;  %1726 = vmatpush3.bf16.xpose.msra.mxu1 %v2803_v43 }
 0x259   : > { %1878 = vtanh.f32 %v951_v38 }
 0x25a   : > { %1880 = vtanh.f32 %v946_v5  ;;  %v2805_v5 = vpack.c.bf16 %v2516_v10, %v2518_v13 }
 0x25b   : > { %v1875_v39 = vpop.eup %1874 }
 0x25c   : > { %v1877_v4 = vpop.eup %1876 }
 0x25d   : > { %v1727_v58 = vpack.c.bf16 %v1875_v39, %v1877_v4 }
 0x25e   : > { %v1629_v37 = vpop.f32.mrb[24].mxu1 }
 0x25f   : > { %v961_v45 = vadd.f32 %v1629_v37, %v2480_v48  ;;  %v955_v44 = vpop.f32.mrb[25].mxu1  ;;  %1728 = vmatprep.subr.bf16.mxu1 %v1727_v58 }
 0x260   : > { %v956_v52 = vadd.f32 %v2480_v48, %v955_v44  ;;  %1730 = vmatpush3.bf16.xpose.msra.mxu1 %v2804_v9 }
 0x261   : > { %1882 = vtanh.f32 %v961_v45  ;;  %v2806_v45 = vpack.c.bf16 %v2524_v2, %v2526_v61 }
 0x262   : > { %1884 = vtanh.f32 %v956_v52 }
 0x263   : > { %v1879_v49 = vpop.eup %1878 }
 0x264   : > { %v1881_v51 = vpop.eup %1880 }
 0x265   : > { %v1731_v38 = vpack.c.bf16 %v1879_v49, %v1881_v51 }
 0x266   : > { %v1632_v42 = vpop.f32.mrb[26].mxu1 }
 0x267   : > { %v971_v41 = vadd.f32 %v1632_v42, %v2480_v48  ;;  %v965_v50 = vpop.f32.mrb[27].mxu1  ;;  %1732 = vmatprep.subr.bf16.mxu1 %v1731_v38  ;;  %v2807_v38 = vpack.c.bf16 %v2532_v54, %v2534_v57 }
 0x268   : > { %v966_v40 = vadd.f32 %v2480_v48, %v965_v50  ;;  %1734 = vmatpush3.bf16.xpose.msra.mxu1 %v2805_v5 }
 0x269   : > { %1886 = vtanh.f32 %v971_v41  ;;  %v2808_v41 = vpack.c.bf16 %v2540_v59, %v2542_v47 }
 0x26a   : > { %1888 = vtanh.f32 %v966_v40 }
 0x26b   : > { %v1883_v7 = vpop.eup %1882 }
 0x26c   : > { %v1885_v63 = vpop.eup %1884 }
 0x26d   : > { %v1735_v43 = vpack.c.bf16 %v1883_v7, %v1885_v63 }
 0x26e   : > { %v1635_v39 = vpop.f32.mrb[28].mxu1 }
 0x26f   : > { %v981_v4 = vadd.f32 %v1635_v39, %v2480_v48  ;;  %v975_v58 = vpop.f32.mrb[29].mxu1  ;;  %1736 = vmatprep.subr.bf16.mxu1 %v1735_v43 }
 0x270   : > { %v976_v37 = vadd.f32 %v2480_v48, %v975_v58  ;;  %1738 = vmatpush3.bf16.xpose.msra.mxu1 %v2806_v45 }
 0x271   : > { %1890 = vtanh.f32 %v981_v4 }
 0x272   : > { %1892 = vtanh.f32 %v976_v37 }
 0x273   : > { %v1887_v10 = vpop.eup %1886 }
 0x274   : > { %v1889_v13 = vpop.eup %1888 }
 0x275   : > { %v1739_v44 = vpack.c.bf16 %v1887_v10, %v1889_v13 }
 0x276   : > { %v1638_v52 = vpop.f32.mrb[30].mxu1 }
 0x277   : > { %v991_v9 = vadd.f32 %v1638_v52, %v2480_v48  ;;  %v985_v49 = vpop.f32.mrb[31].mxu1  ;;  %1740 = vmatprep.subr.bf16.mxu1 %v1739_v44 }
 0x278   : > { %v986_v51 = vadd.f32 %v2480_v48, %v985_v49  ;;  %1742 = vmatpush3.bf16.xpose.msra.mxu1 %v2807_v38  ;;  %v2809_v48 = vpack.c.bf16 %v2548_v0, %v2550_v46 }
 0x279   : > { %1894 = vtanh.f32 %v991_v9 }
 0x27a   : > { %1896 = vtanh.f32 %v986_v51 }
 0x27b   : > { %v1891_v2 = vpop.eup %1890 }
 0x27c   : > { %v1893_v61 = vpop.eup %1892 }
 0x27d   : > { %v1743_v42 = vpack.c.bf16 %v1891_v2, %v1893_v61 }
 0x27f   : > { %1744 = vmatprep.subr.bf16.mxu1 %v1743_v42 }
 0x280   : > { %1746 = vmatpush3.bf16.xpose.msra.mxu1 %v2808_v41 }
 0x283   : > { %v1895_v50 = vpop.eup %1894 }
 0x284   : > { %v1897_v40 = vpop.eup %1896 }
 0x285   : > { %v1747_v5 = vpack.c.bf16 %v1895_v50, %v1897_v40 }
 0x287   : > { %1748 = vmatprep.subr.bf16.mxu1 %v1747_v5 }
 0x288   : > { %1750 = vmatpush3.bf16.xpose.msra.mxu1 %v2809_v48 }
 0x28f   : > { %1558 = vmatmul.mubr.f32.vlgmr.msra.gmra.mrb[32].mxu1 %v2489_v55  ;;  %v1944_v55 = vmov (!%p1467_p5), 0.0  }
 0x290   : > { %1112 = vst.msk [vmem:[#allocation2] sm:$0xf] (!%p1467_p5), %vm1111_vm0, %v1944_v55  ;;  %1113 = vst [vmem:[#allocation3] sm:$0xff] (!%p1467_p5), %v1944_v55 }
 0x362   : > { %v1093_v54 = vpop.f32.mrb[32].mxu1 }
 0x363   : > { %v1098_v57 = vmul.f32 1.442695, %v1093_v54  ;;  %v1095_v7 = vpop.f32.mrb[33].mxu1 }
 0x364   : > { %v1100_v63 = vmul.f32 1.442695, %v1095_v7 }
 0x365   : > { %1898 = vpow2.f32 %v1098_v57 }
 0x366   : > { %1900 = vpow2.f32 %v1100_v63 }
 0x36d   : > { %1110 = sbr.rel (%p1467_p5) target bundleno = 884 (0x374), region = 56 }
 0x36f   : > { %v2594_v59 = vpop.eup %1898 }
 0x370   : > { %v1901_v47 = vpop.eup %1900 }
 0x371   : > { %v1104_v0 = vcombine.low %v2594_v59, %v1901_v47 }
 0x373   : > { %1106 = vst [vmem:[%s384_s13] sm:$0xff] %v1104_v0 }
 0x374 PF: > { %v1751_v46 = vpack.c.bf16 %v2156_v56, %v2052_v12  ;;  %v1753_v43 = vpack.c.bf16 %v2167_v60, %v2150_v53  ;;  %v1755_v39 = vpack.c.bf16 %v2184_v3, %v2170_v62  ;;  %1189 = vmatprep.mubr.f32.mxu1 %v1901_v47  ;;  %v1757_v4 = vpack.c.bf16 %v2195_v6, %v2181_v1  ;;  %v2823_v45 = vld [vmem:[#allocation19_spill] sm:$0xff]  ;;  %v2824_v10 = vld [vmem:[#allocation21_spill] sm:$0xff]  ;;  %v2825_v44 = vld [vmem:[#allocation22_spill] sm:$0xff]  ;;  %p1468_p6 = scmp.ne.s32.totalorder %s2014_s18, 3 }
 0x375   : > { %v1759_v58 = vpack.c.bf16 %v2212_v14, %v2198_v8  ;;  %v1761_v12 = vpack.c.bf16 %v2217_v15, %v2209_v11  ;;  %v1763_v53 = vpack.c.bf16 %v2228_v18, %v2220_v16  ;;  %vm1115_vm1 = vcmask 1043456   ;;  %v2810_v18 = vld [vmem:[#allocation8_spill] sm:$0xff]  ;;  %v2827_v49 = vld [vmem:[#allocation23_spill] sm:$0xff]  ;;  %v2828_v51 = vld [vmem:[#allocation25_spill] sm:$0xff] }
 0x376   : > { %1752 = vmatprep.subr.bf16.mxu1 %v1751_v46  ;;  %v1116_v56 = vsel %vm1115_vm1, %v2594_v59, 0.0  ;;  %v1117_v60 = vsel %vm1115_vm1, %v1901_v47, 0.0  ;;  %v1765_v1 = vpack.c.bf16 %v2233_v19, %v2225_v17  ;;  %v1767_v3 = vpack.c.bf16 %v2244_v22, %v2236_v20  ;;  %v2811_v20 = vld [vmem:[#allocation7_spill] sm:$0xff]  ;;  %v2826_v52 = vld [vmem:[#allocation24_spill] sm:$0xff]  ;;  %v2829_v2 = vld [vmem:[#allocation26_spill] sm:$0xff] }
 0x377   : > { %1754 = vmatpush1.bf16.msra.mxu1 %v1753_v43  ;;  %v1118_v62 = vadd.f32 %v1117_v60, %v1116_v56  ;;  %v1769_v6 = vpack.c.bf16 %v2249_v23, %v2241_v21  ;;  %v1771_v8 = vpack.c.bf16 %v2260_v26, %v2252_v24  ;;  %v1773_v11 = vpack.c.bf16 %v2265_v27, %v2257_v25  ;;  %v2812_v21 = vld [vmem:[#allocation9_spill] sm:$0xff]  ;;  %v2813_v23 = vld [vmem:[#allocation10_spill] sm:$0xff]  ;;  %v2814_v24 = vld [vmem:[#allocation12_spill] sm:$0xff] }
 0x378   : > { %1756 = vmatprep.subr.bf16.mxu1 %v1755_v39  ;;  %v1775_v14 = vpack.c.bf16 %v2276_v30, %v2268_v28  ;;  %v1777_v15 = vpack.c.bf16 %v2281_v31, %v2273_v29  ;;  %v1779_v16 = vpack.c.bf16 %v2292_v34, %v2284_v32  ;;  %v1781_v17 = vpack.c.bf16 %v2297_v35, %v2289_v33  ;;  %v2815_v26 = vld [vmem:[#allocation11_spill] sm:$0xff]  ;;  %v2816_v27 = vld [vmem:[#allocation13_spill] sm:$0xff]  ;;  %v2817_v29 = vld [vmem:[#allocation14_spill] sm:$0xff] }
 0x379   : > { %1119 = vadd.xlane.f32.xlu0 %v1118_v62  ;;  %v1783_v19 = vpack.c.bf16 %v2810_v18, %v2300_v36  ;;  %v1785_v22 = vpack.c.bf16 %v2812_v21, %v2811_v20  ;;  %v1787_v25 = vpack.c.bf16 %v2814_v24, %v2813_v23  ;;  %v1789_v28 = vpack.c.bf16 %v2816_v27, %v2815_v26  ;;  %v2818_v30 = vld [vmem:[#allocation16_spill] sm:$0xff]  ;;  %v2819_v32 = vld [vmem:[#allocation15_spill] sm:$0xff]  ;;  %v2820_v33 = vld [vmem:[#allocation17_spill] sm:$0xff] }
 0x37a   : > { %v1791_v31 = vpack.c.bf16 %v2818_v30, %v2817_v29  ;;  %v1793_v34 = vpack.c.bf16 %v2820_v33, %v2819_v32  ;;  %v2821_v35 = vld [vmem:[#allocation18_spill] sm:$0xff]  ;;  %v2822_v36 = vld [vmem:[#allocation20_spill] sm:$0xff]  ;;  %v1797_v13 = vpack.c.bf16 %v2824_v10, %v2823_v45  ;;  %v1799_v9 = vpack.c.bf16 %v2826_v52, %v2825_v44  ;;  %v2831_v41 = vld [vmem:[#allocation27_spill] sm:$0xff] }
 0x37b   : > { %1758 = vmatpush1.bf16.msra.mxu1 %v1757_v4  ;;  %v1795_v37 = vpack.c.bf16 %v2822_v36, %v2821_v35  ;;  %v1801_v38 = vpack.c.bf16 %v2828_v51, %v2827_v49  ;;  %v2830_v61 = vld [vmem:[#allocation28_spill] sm:$0xff]  ;;  %v2832_v50 = vld [vmem:[#allocation29_spill] sm:$0xff]  ;;  %v2833_v5 = vld [vmem:[#allocation30_spill] sm:$0xff]  ;;  %vm1122_vm2 = vcmask 3072  }
 0x37c   : > { %1760 = vmatprep.subr.bf16.mxu1 %v1759_v58  ;;  %v1803_v42 = vpack.c.bf16 %v2830_v61, %v2829_v2  ;;  %v1805_v40 = vpack.c.bf16 %v2832_v50, %v2831_v41  ;;  %v2834_v48 = vld [vmem:[#allocation32_spill] sm:$0xff]  ;;  %v2835_v57 = vld [vmem:[#allocation31_spill] sm:$0xff]  ;;  %v2836_v7 = vld [vmem:[#allocation33_spill] sm:$0xff] }
 0x37d   : > { %v1807_v54 = vpack.c.bf16 %v2834_v48, %v2833_v5  ;;  %v1809_v63 = vpack.c.bf16 %v2836_v7, %v2835_v57  ;;  %v2837_v47 = vld [vmem:[#allocation34_spill] sm:$0xff]  ;;  %v2838_v0 = vld [vmem:[#allocation36_spill] sm:$0xff]  ;;  %v2839_v46 = vld [vmem:[#allocation35_spill] sm:$0xff] }
 0x37e   : > { %v1811_v55 = vpack.c.bf16 %v2838_v0, %v2837_v47  ;;  %v2840_v43 = vld [vmem:[#allocation37_spill] sm:$0xff]  ;;  %v1114_v4 = vld [vmem:[#allocation2] sm:$0xf]  ;;  %v1470_v41 = vld [vmem:[%s2734_s6 + $0x10] sm:$0xff] (!%p1468_p6) }
 0x37f   : > { %1762 = vmatpush1.bf16.msra.mxu1 %v1761_v12  ;;  %v1813_v39 = vpack.c.bf16 %v2840_v43, %v2839_v46  ;;  %v1124_v56 = vld [vmem:[#allocation3] sm:$0xff] }
 0x380   : > { %1764 = vmatprep.subr.bf16.mxu1 %v1763_v53  ;;  %v1469_v52 = vld [vmem:[%s2734_s6 + $0x8] sm:$0xff] (!%p1468_p6) }
 0x383   : > { %1766 = vmatpush1.bf16.msra.mxu1 %v1765_v1 }
 0x384   : > { %1768 = vmatprep.subr.bf16.mxu1 %v1767_v3 }
 0x387   : > { %1770 = vmatpush1.bf16.msra.mxu1 %v1769_v6  ;;  %v1945_v6 = vmov (!%p1468_p6), 0  }
 0x388   : > { %1772 = vmatprep.subr.bf16.mxu1 %v1771_v8  ;;  %1902 = vset.pattern.permute.xlu0 (!%p1468_p6), %v1945_v6  ;;  %v1946_v8 = vmov (!%p1468_p6), 839922192   ;;  %v1225_v6 = vld [vmem:[%s2735_s7] sm:$0xf] (!%p1468_p6) }
 0x38b   : > { %1774 = vmatpush1.bf16.msra.mxu1 %v1773_v11  ;;  %v1215_v11 = vunpack.c.l.s4 (!%p1468_p6), %v1946_v8 }
 0x38c   : > { %1776 = vmatprep.subr.bf16.mxu1 %v1775_v14  ;;  %v1217_v14 = vlaneseq (!%p1468_p6) }
 0x38f   : > { %1778 = vmatpush1.bf16.msra.mxu1 %v1777_v15  ;;  %v1216_v15 = vunpack.c.0.s8 (!%p1468_p6), %v1215_v11 }
 0x390   : > { %1780 = vmatprep.subr.bf16.mxu1 %v1779_v16  ;;  %v1218_v16 = vshrl.u32 (!%p1468_p6), %v1217_v14, 7 }
 0x392   : > { %v1264_v20 = vsub.s32 (!%p1468_p6), 1, %v1218_v16  ;;  %v1230_v23 = vsub.s32 (!%p1468_p6), 0, %v1218_v16  ;;  %v1234_v24 = vsub.s32 (!%p1468_p6), 4, %v1218_v16  ;;  %v1302_v26 = vsub.s32 (!%p1468_p6), 6, %v1218_v16 }
 0x393   : > { %1782 = vmatpush1.bf16.msra.mxu1 %v1781_v17  ;;  %v1219_v17 = vsub.s32 (!%p1468_p6), %v1216_v15, %v1218_v16  ;;  %v1332_v27 = vsub.s32 (!%p1468_p6), 3, %v1218_v16 }
 0x394   : > { %1784 = vmatprep.subr.bf16.mxu1 %v1783_v19 }
 0x397   : > { %1786 = vmatpush1.bf16.msra.mxu1 %v1785_v22  ;;  %v1268_v22 = vsub.s32 (!%p1468_p6), 5, %v1218_v16 }
 0x398   : > { %1788 = vmatprep.subr.bf16.mxu1 %v1787_v25  ;;  %v1298_v25 = vsub.s32 (!%p1468_p6), 2, %v1218_v16 }
 0x39b   : > { %1790 = vmatpush1.bf16.msra.mxu1 %v1789_v28  ;;  %v1336_v28 = vsub.s32 (!%p1468_p6), 7, %v1218_v16 }
 0x39c   : > { %1792 = vmatprep.subr.bf16.mxu1 %v1791_v31 }
 0x39f   : > { %1794 = vmatpush1.bf16.msra.mxu1 %v1793_v34 }
 0x3a0   : > { %1796 = vmatprep.subr.bf16.mxu1 %v1795_v37 }
 0x3a3   : > { %1798 = vmatpush1.bf16.msra.mxu1 %v1797_v13 }
 0x3a4   : > { %1800 = vmatprep.subr.bf16.mxu1 %v1799_v9  ;;  %v1226_v9 = vld [vmem:[%s2734_s6] sm:$0xff] (!%p1468_p6) }
 0x3a7   : > { %1802 = vmatpush1.bf16.msra.mxu1 %v1801_v38 }
 0x3a8   : > { %1804 = vmatprep.subr.bf16.mxu1 %v1803_v42 }
 0x3ab   : > { %1806 = vmatpush1.bf16.msra.mxu1 %v1805_v40  ;;  %v1471_v40 = vld [vmem:[%s2734_s6 + $0x18] sm:$0xff] (!%p1468_p6) }
 0x3ac   : > { %1808 = vmatprep.subr.bf16.mxu1 %v1807_v54 }
 0x3af   : > { %1810 = vmatpush1.bf16.msra.mxu1 %v1809_v63 }
 0x3b0   : > { %1812 = vmatprep.subr.bf16.mxu1 %v1811_v55 }
 0x3b3   : > { %1814 = vmatpush1.bf16.msra.mxu1 %v1813_v39 }
 0x3b6   : > { %1190 = vmatmul.mubr.f32.vlgmr.msra.gmra.mrb[34].mxu1 %v2594_v59 }
 0x406   : > { %v1120_v58 = vpop.xlane.xlu0 %1119 }
 0x407   : > { %v1121_v12 = vadd.f32 %v1120_v58, %v1114_v4 }
 0x409   : > { %1123 = vst.msk [vmem:[#allocation2] sm:$0xf] %vm1122_vm2, %v1121_v12 }
 0x410   : > { %v1206_v3 = vld [vmem:[#allocation2] sm:$0xf] (!%p1468_p6) }
 0x411   : > { %1903 = vrcp.f32 (!%p1468_p6), %v1206_v3 }
 0x41b   : > { %v1904_v59 = vpop.eup (!%p1468_p6), %1903 }
 0x41c   : > { %1212 = vperm.xlu0 (!%p1468_p6), %1902, %v1904_v59   ;;  %1224 = vst.msk [vmem:[%s2739_s11] sm:$0xf] (!%p1468_p6), %vm1122_vm2, %v1904_v59 }
 0x489   : > { %v1191_v53 = vpop.f32.mrb[34].mxu1  ;;  %1205 = sbr.rel (%p1468_p6) target bundleno = 1350 (0x546), region = 60 }
 0x48a   : > { %v1193_v60 = vpop.f32.mrb[35].mxu1 }
 0x48b   : > { %v1198_v62 = vcombine.low %v1191_v53, %v1193_v60 }
 0x48d   : > { %v1200_v1 = vadd.f32 %v1198_v62, %v1124_v56 }
 0x48f   : > { %1201 = vst [vmem:[#allocation3] sm:$0xff] %v1200_v1 }
 0x496   : > { %v1209_v18 = vld [vmem:[#allocation3] sm:$0xff] }
 0x49b   : > { %v1213_v19 = vpop.permute.xlu0 %1212 }
 0x49c   : > { %v1220_v21 = vrot.slane %v1213_v19, %v1219_v17 }
 0x49e   : > { %v1222_v29 = vmul.f32 %v1220_v21, %v1209_v18 }
 0x4a0   : > { %1223 = vst [vmem:[#allocation4] sm:$0xff] %v1222_v29  ;;  %v1265_v30 = vrot.slane %v1222_v29, %v1264_v20  ;;  %v1269_v31 = vrot.slane %v1222_v29, %v1268_v22  ;;  %v1231_v32 = vrot.slane %v1222_v29, %v1230_v23  ;;  %v1235_v33 = vrot.slane %v1222_v29, %v1234_v24 }
 0x4a1   : > { %v1299_v34 = vrot.slane %v1222_v29, %v1298_v25  ;;  %v1303_v35 = vrot.slane %v1222_v29, %v1302_v26  ;;  %v1333_v36 = vrot.slane %v1222_v29, %v1332_v27  ;;  %v1337_v37 = vrot.slane %v1222_v29, %v1336_v28 }
 0x4a2   : > { %v1275_v45 = vrot.slane %v1265_v30, %v1264_v20  ;;  %v1279_v10 = vrot.slane %v1269_v31, %v1264_v20  ;;  %v1241_v13 = vrot.slane %v1231_v32, %v1230_v23  ;;  %v1245_v44 = vrot.slane %v1235_v33, %v1230_v23 }
 0x4a3   : > { %v1309_v49 = vrot.slane %v1299_v34, %v1298_v25  ;;  %v1313_v51 = vrot.slane %v1303_v35, %v1298_v25  ;;  %v1343_v38 = vrot.slane %v1333_v36, %v1332_v27  ;;  %v1347_v2 = vrot.slane %v1337_v37, %v1332_v27 }
 0x4a4   : > { %v1282_v61 = vcombine.low %v1275_v45, %v1279_v10  ;;  %v1248_v42 = vcombine.low %v1241_v13, %v1245_v44 }
 0x4a5   : > { %v1316_v50 = vcombine.low %v1309_v49, %v1313_v51  ;;  %v1350_v5 = vcombine.low %v1343_v38, %v1347_v2 }
 0x4a6   : > { %v1284_v48 = vmul.f32 %v1469_v52, %v1282_v61  ;;  %v1250_v54 = vmul.f32 %v1248_v42, %v1226_v9 }
 0x4a7   : > { %v1318_v57 = vmul.f32 %v1470_v41, %v1316_v50  ;;  %v1352_v47 = vmul.f32 %v1471_v40, %v1350_v5 }
 0x4a8   : > { %v1286_v7 = vcombine.high %v1284_v48, %v1284_v48  ;;  %v1252_v63 = vcombine.high %v1250_v54, %v1250_v54  ;;  %v1288_v55 = vsel %vm1115_vm1, %v1284_v48, 0.0  ;;  %v1254_v43 = vsel %vm1115_vm1, %v1250_v54, 0.0 }
 0x4a9   : > { %v1320_v0 = vcombine.high %v1318_v57, %v1318_v57  ;;  %v1354_v53 = vcombine.high %v1352_v47, %v1352_v47  ;;  %v1322_v56 = vsel %vm1115_vm1, %v1318_v57, 0.0  ;;  %v1356_v1 = vsel %vm1115_vm1, %v1352_v47, 0.0 }
 0x4aa   : > { %v1289_v46 = vsel %vm1115_vm1, %v1286_v7, 0.0  ;;  %v1255_v39 = vsel %vm1115_vm1, %v1252_v63, 0.0 }
 0x4ab   : > { %v1290_v4 = vadd.f32 %v1289_v46, %v1288_v55  ;;  %v1256_v58 = vadd.f32 %v1255_v39, %v1254_v43  ;;  %v1323_v12 = vsel %vm1115_vm1, %v1320_v0, 0.0  ;;  %v1357_v62 = vsel %vm1115_vm1, %v1354_v53, 0.0 }
 0x4ac   : > { %v1324_v60 = vadd.f32 %v1323_v12, %v1322_v56  ;;  %v1358_v3 = vadd.f32 %v1357_v62, %v1356_v1 }
 0x4ad   : > { %1291 = vadd.xlane.f32.xlu1 %v1290_v4  ;;  %1257 = vadd.xlane.f32.xlu0 %v1256_v58 }
 0x4b1   : > { %1325 = vadd.xlane.f32.xlu1 %v1324_v60 }
 0x4b5   : > { %1359 = vadd.xlane.f32.xlu1 %v1358_v3 }
 0x53a   : > { %v1292_v59 = vpop.xlane.xlu1 %1291  ;;  %v1258_v8 = vpop.xlane.xlu0 %1257 }
 0x53b   : > { %v1259_v11 = vadd.f32 %v1258_v8, %v1225_v6 }
 0x53d   : > { %v1293_v14 = vadd.f32 %v1292_v59, %v1259_v11 }
 0x53e   : > { %v1326_v15 = vpop.xlane.xlu1 %1325 }
 0x53f   : > { %v1327_v16 = vadd.f32 %v1326_v15, %v1293_v14 }
 0x542   : > { %v1360_v17 = vpop.xlane.xlu1 %1359 }
 0x543   : > { %v1361_v18 = vadd.f32 %v1360_v17, %v1327_v16 }
 0x545   : > { %1362 = vst.msk [vmem:[%s2738_s10] sm:$0xf] %vm1122_vm2, %v1361_v18 }
 0x546 PF: > { %p1819_p7 = scmp.eq.s32.totalorder %s2014_s18, 3  ;;  %s1947_s30 = smov [#allocation4]  }
 0x547   : > { %s1379_s12 = sshll.u32 %s1947_s30, 4  ;;  %s1380_s12 = int_to_ptr.vmem [resolvable:$true] %s1379_s12 }
 0x548   : > { %s1905_s13 = scalar_lea.vmem %s1380_s12, 128  ;;  %p1912_p11 = scmp.lt.s32.totalorder %s1380_s12, %s1380_s12 }
 0x549   : > { %p1906_p8 = scmp.ne.s32.totalorder %s1380_s12, %s1905_s13  ;;  %p1913_p12 = scmp.lt.s32.totalorder %s1905_s13, %s1905_s13 }
 0x54b   : > { %p1907_p9 = pnand %p1906_p8, %p1819_p7  ;;  %p1914_p13 = por %p1913_p12, %p1912_p11 }
 0x54d   : > { %p1908_p10 = pneg %p1907_p9 }
 0x54f   : > { %p1915_p0 = pnand %p1914_p13, %p1908_p10 }
 0x551   : > { %1918 = shalt.err (!%p1915_p0)
}
 0x552   : > { %s1919_s19 = scalar_lea.hbm %s2737_s9, 128 }
 0x553   : > { %p1920_p1 = scmp.ne.s32.totalorder %s2737_s9, %s1919_s19  ;;  %p1925_p4 = scmp.lt.u32.totalorder %s1919_s19, %s2737_s9 }
 0x555   : > { %p1921_p2 = pnand %p1920_p1, %p1819_p7 }
 0x557   : > { %p1922_p3 = pneg %p1921_p2 }
 0x559   : > { %p1927_p5 = pnand %p1925_p4, %p1922_p3 }
 0x55b   : > { %1930 = shalt.err (!%p1927_p5)
}
 0x55c   : > { %1816 = dma.vmem_to_hbm [thread:$0]  (%p1819_p7), %s1380_s12, 128, %s2737_s9, [#allocation5]  }
 0x55d   : > { %1936 = dma.done.wait (%p1819_p7), [#allocation5], 128  }
 0x55e   : > { %1938 = vsyncadd (%p1819_p7), [#allocation5], 4294967168 }
 0x55f PF: > { %s23_s17 = sadd.s32 1, %s1941_s17  }
 0x560   : > { %p20_p6 = scmp.ge.s32.totalorder %s23_s17, 6  }
 0x562   :  { %22 = sbr.rel (!%p20_p6) target bundleno = 1 (0x1), region = 118 }
 0x569   :  { %1412 = vsyncpa [#allocation5], 1 }
 0x56a   :  { %1414 = vsyncpa [#allocation5 + $0x1], 1 }

</bundles_post_ra>
